<compile_context>
chip_gen: v6e
topology: v6e:2x2x1
jax: 0.10.0
libtpu: 0.0.40
codegen_flags: <defaults>
</compile_context>

<pallas_src>
from functools import partial

import jax
import jax.numpy as jnp
from jax.experimental import pallas as pl
from jax.experimental.pallas import tpu as pltpu

LAYER_NUM = 5
INPUT_SIZE = 10
HIDDEN = 16
OUT = 1


def _round_up(x, m):
    return (x + m - 1) // m * m


def _device_defaults():
    """(group, bf16_elementwise) per TPU generation.

    v6e / v7x: 256-lane packing (fills the 256x256 MXU) + bf16 VPU elementwise.
    v5e and anything unrecognized: 128-lane packing + f32 VPU elementwise.
    """
    try:
        kind = jax.devices()[0].device_kind.lower()
    except Exception:
        kind = ""
    wide = any(tag in kind for tag in ("v6", "v7", "tpu7", "7x"))
    if wide:
        return 16, True
    return 8, False


def mlp_kernel(x_ref, w_ref, b_ref, o_ref, *, group, bf16_elementwise):
    """Fused forward pass on lane-packed activations.

    x_ref: (tile_g, lanes) bf16 -- `group` examples per row, 16 lanes each
                                   (features 10 zero-padded to 16)
    w_ref: (6, lanes, lanes) bf16 -- group-way block-diagonal weights (VMEM-resident)
    b_ref: (8, lanes) f32         -- rows 0..5 = packed biases, rows 6..7 zero pad
    o_ref: (group, tile_g) f32    -- dense per-example outputs (row j of packed row r
                                     = example r*group + j)
    """
    h = x_ref[...]                       # bf16 MXU input
    biases = b_ref[...]                  # f32
    if bf16_elementwise:
        biases_e = biases.astype(jnp.bfloat16)   # hoisted, once per grid step

    for i in range(LAYER_NUM):           # 5 x (Linear + ReLU), fully unrolled
        acc = jnp.dot(h, w_ref[i], preferred_element_type=jnp.float32)
        if bf16_elementwise:
            # v6e/v7x: packed bf16 VALU add + max, no extra cast op.
            h = jnp.maximum(acc.astype(jnp.bfloat16) + biases_e[i:i + 1, :], 0)
        else:
            # v5e: keep bias add + ReLU in f32 (no bf16 VALU), cast once for the MXU.
            acc = acc + biases[i:i + 1, :]
            h = jnp.maximum(acc, 0.0).astype(jnp.bfloat16)

    out = jnp.dot(h, w_ref[LAYER_NUM], preferred_element_type=jnp.float32)
    out = out + biases[LAYER_NUM:LAYER_NUM + 1, :]
    # Densify: only lanes 0..group-1 carry data. Full-block transpose (lane-dense,
    # tile_g is a multiple of 128), then keep the first `group` sublanes.
    o_ref[...] = jnp.transpose(out)[:group, :]


def pack_params(params, group):
    """Pack 6 (W (in,out), b) pairs into (6,lanes,lanes) bf16 weights + (8,lanes) f32 biases."""
    lanes = group * HIDDEN
    eye = jnp.eye(group, dtype=jnp.float32)
    ws, bs = [], []

    # Layer 0: (10,16) zero-padded to (16,16), then group-way block-diagonal.
    w0, b0 = params[0]
    w0p = jnp.zeros((HIDDEN, HIDDEN), jnp.float32).at[:INPUT_SIZE, :].set(w0)
    ws.append(jnp.kron(eye, w0p))
    bs.append(jnp.tile(b0, group))

    # Layers 1..4: (16,16) block-diagonal.
    for w, b in params[1:LAYER_NUM]:
        ws.append(jnp.kron(eye, w))
        bs.append(jnp.tile(b, group))

    # Final layer (16 -> 1): packed example j of each group writes output lane j.
    w5, b5 = params[LAYER_NUM]
    wf = jnp.zeros((lanes, lanes), jnp.float32)
    for j in range(group):
        wf = wf.at[j * HIDDEN:(j + 1) * HIDDEN, j].set(w5[:, 0])
    ws.append(wf)
    bs.append(jnp.zeros((lanes,), jnp.float32).at[:group].set(b5[0]))

    w_stack = jnp.stack(ws).astype(jnp.bfloat16)                          # (6,lanes,lanes)
    b_stack = jnp.zeros((8, lanes), jnp.float32).at[:LAYER_NUM + 1].set(  # (8,lanes)
        jnp.stack(bs))
    return w_stack, b_stack


@partial(jax.jit, static_argnames=("tile_g", "group", "bf16_elementwise"))
def _mlp_forward_impl(x, params, *, tile_g, group, bf16_elementwise):
    B = x.shape[0]
    lanes = group * HIDDEN
    w_stack, b_stack = pack_params(params, group)

    rows = pl.cdiv(max(B, 1), group)                    # packed rows needed
    # tile_g must be a multiple of 128 (lane-dense transposed output block).
    tile_g = max(128, _round_up(min(tile_g, _round_up(rows, 128)), 128))
    # Prefer >= 2 grid steps when there is enough work (v7x has 2 TensorCores).
    if rows > 128 and pl.cdiv(rows, tile_g) < 2:
        tile_g = max(128, _round_up(pl.cdiv(rows, 2), 128))
    rows_p = _round_up(rows, tile_g)
    b_padded = rows_p * group

    # Pad features 10 -> 16 and batch -> b_padded, pack `group` examples per row.
    # (Fused under this jit: single pass producing the packed bf16 layout.)
    x_pad = jnp.zeros((b_padded, HIDDEN), jnp.float32).at[:B, :INPUT_SIZE].set(
        x.astype(jnp.float32))
    x_packed = x_pad.reshape(rows_p, lanes).astype(jnp.bfloat16)

    kernel = partial(mlp_kernel, group=group, bf16_elementwise=bf16_elementwise)
    grid = (rows_p // tile_g,)
    out_packed = pl.pallas_call(
        kernel,
        out_shape=jax.ShapeDtypeStruct((group, rows_p), jnp.float32),
        grid=grid,
        in_specs=[
            pl.BlockSpec((tile_g, lanes), lambda i: (i, 0)),                   # x: pipelined
            pl.BlockSpec((LAYER_NUM + 1, lanes, lanes), lambda i: (0, 0, 0)),  # weights: resident
            pl.BlockSpec((8, lanes), lambda i: (0, 0)),                        # biases: resident
        ],
        out_specs=pl.BlockSpec((group, tile_g), lambda i: (0, i)),             # dense output
        compiler_params=pltpu.CompilerParams(dimension_semantics=("parallel",)),
    )(x_packed, w_stack, b_stack)

    # out_packed[j, r] = output of example r*group + j.
    out = out_packed.T.reshape(b_padded, OUT)
    return out[:B]


def mlp_forward(x, params, tile_g=2048, group=None, bf16_elementwise=None):
    """x: (B, INPUT_SIZE) float. params: list of 6 (W (in,out), b) pairs. Returns (B, 1) f32."""
    if group is None or bf16_elementwise is None:
        g_def, bf_def = _device_defaults()
        group = g_def if group is None else group
        bf16_elementwise = bf_def if bf16_elementwise is None else bf16_elementwise
    return _mlp_forward_impl(x, params, tile_g=int(tile_g), group=int(group),
                             bf16_elementwise=bool(bf16_elementwise))


def init_params(key):
    """Deterministic init mimicking PyTorch nn.Linear default; stored as (in, out)."""
    sizes = [INPUT_SIZE] + [HIDDEN] * LAYER_NUM + [OUT]
    params = []
    for i in range(len(sizes) - 1):
        fan_in, fan_out = sizes[i], sizes[i + 1]
        key, kw, kb = jax.random.split(key, 3)
        bound = 1.0 / jnp.sqrt(float(fan_in))
        w = jax.random.uniform(kw, (fan_in, fan_out), jnp.float32, -bound, bound)
        b = jax.random.uniform(kb, (fan_out,), jnp.float32, -bound, bound)
        params.append((w, b))
    return params


def reference_forward(x, params):
    h = x.astype(jnp.float32)
    for i, (w, b) in enumerate(params):
        h = h @ w + b
        if i < len(params) - 1:
            h = jnp.maximum(h, 0.0)
    return h


if __name__ == "__main__":
    key = jax.random.PRNGKey(0)
    kx, kp = jax.random.split(key)
    # Not a multiple of GROUP (exercises padding) and large enough that the tile
    # clamp yields a >= 2-step batch grid, while staying a small problem overall.
    batch = 2500
    # The PyTorch module casts array-like input to float32; we take float32 directly.
    x = jax.random.normal(kx, (batch, INPUT_SIZE), jnp.float32)
    params = init_params(kp)

    out = mlp_forward(x, params)
    out = jax.block_until_ready(out)

    ref = reference_forward(x, params)
    assert out.shape == (batch, OUT)
    # bf16 MXU inputs (and bf16 bias/ReLU on v6e/v7x) with f32 accumulation ->
    # relaxed tolerance vs the full-f32 reference.
    assert jnp.allclose(out, ref, atol=6e-2, rtol=6e-2), (
        float(jnp.max(jnp.abs(out - ref))))
    print("KERNEL_OK")
</pallas_src>

<mosaic_0001>
module attributes {stable_mosaic.version = 11 : i64} {
  func.func @mlp_kernel(%arg0: i32, %arg1: memref<256x128xbf16, #tpu.memory_space<vmem>>, %arg2: memref<6x128x128xbf16, #tpu.memory_space<vmem>>, %arg3: memref<8x128xf32, #tpu.memory_space<vmem>>, %arg4: memref<8x256xf32, #tpu.memory_space<vmem>>) attributes {dimension_semantics = [#tpu.dimension_semantics<parallel>], iteration_bounds = array<i64: 2>, scalar_prefetch = 0 : i64, scratch_operands = 0 : i64, tpu.core_type = #tpu.core_type<tc>, window_params = [{transform_indices = @transform_0, window_bounds = array<i64: 256, 128>}, {pipeline_mode = #tpu.pipeline_mode<synchronous>, transform_indices = @transform_1, window_bounds = array<i64: 6, 128, 128>}, {pipeline_mode = #tpu.pipeline_mode<synchronous>, transform_indices = @transform_2, window_bounds = array<i64: 8, 128>}, {transform_indices = @transform_3, window_bounds = array<i64: 8, 256>}]} {
    %c0 = arith.constant 0 : index
    %c0_0 = arith.constant 0 : index
    %0 = vector.load %arg1[%c0, %c0_0] : memref<256x128xbf16, #tpu.memory_space<vmem>>, vector<256x128xbf16>
    %c0_1 = arith.constant 0 : index
    %c0_2 = arith.constant 0 : index
    %1 = vector.load %arg3[%c0_1, %c0_2] : memref<8x128xf32, #tpu.memory_space<vmem>>, vector<8x128xf32>
    %c0_3 = arith.constant 0 : index
    %c0_4 = arith.constant 0 : index
    %c0_5 = arith.constant 0 : index
    %2 = vector.load %arg2[%c0_3, %c0_4, %c0_5] : memref<6x128x128xbf16, #tpu.memory_space<vmem>>, vector<1x128x128xbf16>
    %3 = vector.shape_cast %2 : vector<1x128x128xbf16> to vector<128x128xbf16>
    %cst = arith.constant dense<0.000000e+00> : vector<256x128xf32>
    %4 = tpu.matmul %0, %3, %cst {dimension_numbers = #tpu.dot_dimension_numbers<[1], [0], [0], [1], [0, 0, 1, 1], [], []>} : vector<256x128xbf16>, vector<128x128xbf16>, vector<256x128xf32> -> vector<256x128xf32>
    %5 = vector.extract_strided_slice %1 {offsets = [0, 0], sizes = [1, 128], strides = [1, 1]} : vector<8x128xf32> to vector<1x128xf32>
    %6 = vector.broadcast %5 : vector<1x128xf32> to vector<256x128xf32>
    %7 = arith.addf %4, %6 : vector<256x128xf32>
    %cst_6 = arith.constant 0.000000e+00 : f32
    %8 = vector.broadcast %cst_6 : f32 to vector<256x128xf32>
    %9 = arith.maximumf %7, %8 : vector<256x128xf32>
    %10 = arith.truncf %9 : vector<256x128xf32> to vector<256x128xbf16>
    %c1 = arith.constant 1 : index
    %c0_7 = arith.constant 0 : index
    %c0_8 = arith.constant 0 : index
    %11 = vector.load %arg2[%c1, %c0_7, %c0_8] : memref<6x128x128xbf16, #tpu.memory_space<vmem>>, vector<1x128x128xbf16>
    %12 = vector.shape_cast %11 : vector<1x128x128xbf16> to vector<128x128xbf16>
    %cst_9 = arith.constant dense<0.000000e+00> : vector<256x128xf32>
    %13 = tpu.matmul %10, %12, %cst_9 {dimension_numbers = #tpu.dot_dimension_numbers<[1], [0], [0], [1], [0, 0, 1, 1], [], []>} : vector<256x128xbf16>, vector<128x128xbf16>, vector<256x128xf32> -> vector<256x128xf32>
    %14 = vector.extract_strided_slice %1 {offsets = [1, 0], sizes = [1, 128], strides = [1, 1]} : vector<8x128xf32> to vector<1x128xf32>
    %15 = vector.broadcast %14 : vector<1x128xf32> to vector<256x128xf32>
    %16 = arith.addf %13, %15 : vector<256x128xf32>
    %cst_10 = arith.constant 0.000000e+00 : f32
    %17 = vector.broadcast %cst_10 : f32 to vector<256x128xf32>
    %18 = arith.maximumf %16, %17 : vector<256x128xf32>
    %19 = arith.truncf %18 : vector<256x128xf32> to vector<256x128xbf16>
    %c2 = arith.constant 2 : index
    %c0_11 = arith.constant 0 : index
    %c0_12 = arith.constant 0 : index
    %20 = vector.load %arg2[%c2, %c0_11, %c0_12] : memref<6x128x128xbf16, #tpu.memory_space<vmem>>, vector<1x128x128xbf16>
    %21 = vector.shape_cast %20 : vector<1x128x128xbf16> to vector<128x128xbf16>
    %cst_13 = arith.constant dense<0.000000e+00> : vector<256x128xf32>
    %22 = tpu.matmul %19, %21, %cst_13 {dimension_numbers = #tpu.dot_dimension_numbers<[1], [0], [0], [1], [0, 0, 1, 1], [], []>} : vector<256x128xbf16>, vector<128x128xbf16>, vector<256x128xf32> -> vector<256x128xf32>
    %23 = vector.extract_strided_slice %1 {offsets = [2, 0], sizes = [1, 128], strides = [1, 1]} : vector<8x128xf32> to vector<1x128xf32>
    %24 = vector.broadcast %23 : vector<1x128xf32> to vector<256x128xf32>
    %25 = arith.addf %22, %24 : vector<256x128xf32>
    %cst_14 = arith.constant 0.000000e+00 : f32
    %26 = vector.broadcast %cst_14 : f32 to vector<256x128xf32>
    %27 = arith.maximumf %25, %26 : vector<256x128xf32>
    %28 = arith.truncf %27 : vector<256x128xf32> to vector<256x128xbf16>
    %c3 = arith.constant 3 : index
    %c0_15 = arith.constant 0 : index
    %c0_16 = arith.constant 0 : index
    %29 = vector.load %arg2[%c3, %c0_15, %c0_16] : memref<6x128x128xbf16, #tpu.memory_space<vmem>>, vector<1x128x128xbf16>
    %30 = vector.shape_cast %29 : vector<1x128x128xbf16> to vector<128x128xbf16>
    %cst_17 = arith.constant dense<0.000000e+00> : vector<256x128xf32>
    %31 = tpu.matmul %28, %30, %cst_17 {dimension_numbers = #tpu.dot_dimension_numbers<[1], [0], [0], [1], [0, 0, 1, 1], [], []>} : vector<256x128xbf16>, vector<128x128xbf16>, vector<256x128xf32> -> vector<256x128xf32>
    %32 = vector.extract_strided_slice %1 {offsets = [3, 0], sizes = [1, 128], strides = [1, 1]} : vector<8x128xf32> to vector<1x128xf32>
    %33 = vector.broadcast %32 : vector<1x128xf32> to vector<256x128xf32>
    %34 = arith.addf %31, %33 : vector<256x128xf32>
    %cst_18 = arith.constant 0.000000e+00 : f32
    %35 = vector.broadcast %cst_18 : f32 to vector<256x128xf32>
    %36 = arith.maximumf %34, %35 : vector<256x128xf32>
    %37 = arith.truncf %36 : vector<256x128xf32> to vector<256x128xbf16>
    %c4 = arith.constant 4 : index
    %c0_19 = arith.constant 0 : index
    %c0_20 = arith.constant 0 : index
    %38 = vector.load %arg2[%c4, %c0_19, %c0_20] : memref<6x128x128xbf16, #tpu.memory_space<vmem>>, vector<1x128x128xbf16>
    %39 = vector.shape_cast %38 : vector<1x128x128xbf16> to vector<128x128xbf16>
    %cst_21 = arith.constant dense<0.000000e+00> : vector<256x128xf32>
    %40 = tpu.matmul %37, %39, %cst_21 {dimension_numbers = #tpu.dot_dimension_numbers<[1], [0], [0], [1], [0, 0, 1, 1], [], []>} : vector<256x128xbf16>, vector<128x128xbf16>, vector<256x128xf32> -> vector<256x128xf32>
    %41 = vector.extract_strided_slice %1 {offsets = [4, 0], sizes = [1, 128], strides = [1, 1]} : vector<8x128xf32> to vector<1x128xf32>
    %42 = vector.broadcast %41 : vector<1x128xf32> to vector<256x128xf32>
    %43 = arith.addf %40, %42 : vector<256x128xf32>
    %cst_22 = arith.constant 0.000000e+00 : f32
    %44 = vector.broadcast %cst_22 : f32 to vector<256x128xf32>
    %45 = arith.maximumf %43, %44 : vector<256x128xf32>
    %46 = arith.truncf %45 : vector<256x128xf32> to vector<256x128xbf16>
    %c5 = arith.constant 5 : index
    %c0_23 = arith.constant 0 : index
    %c0_24 = arith.constant 0 : index
    %47 = vector.load %arg2[%c5, %c0_23, %c0_24] : memref<6x128x128xbf16, #tpu.memory_space<vmem>>, vector<1x128x128xbf16>
    %48 = vector.shape_cast %47 : vector<1x128x128xbf16> to vector<128x128xbf16>
    %cst_25 = arith.constant dense<0.000000e+00> : vector<256x128xf32>
    %49 = tpu.matmul %46, %48, %cst_25 {dimension_numbers = #tpu.dot_dimension_numbers<[1], [0], [0], [1], [0, 0, 1, 1], [], []>} : vector<256x128xbf16>, vector<128x128xbf16>, vector<256x128xf32> -> vector<256x128xf32>
    %50 = vector.extract_strided_slice %1 {offsets = [5, 0], sizes = [1, 128], strides = [1, 1]} : vector<8x128xf32> to vector<1x128xf32>
    %51 = vector.broadcast %50 : vector<1x128xf32> to vector<256x128xf32>
    %52 = arith.addf %49, %51 : vector<256x128xf32>
    %53 = tpu.transpose %52, [1, 0] : vector<256x128xf32> -> vector<128x256xf32>
    %54 = vector.extract_strided_slice %53 {offsets = [0, 0], sizes = [8, 256], strides = [1, 1]} : vector<128x256xf32> to vector<8x256xf32>
    %c0_26 = arith.constant 0 : index
    %c0_27 = arith.constant 0 : index
    %55 = vector.load %arg4[%c0_26, %c0_27] : memref<8x256xf32, #tpu.memory_space<vmem>>, vector<8x256xf32>
    tpu.vector_store %arg4[%c0_26, %c0_27], %54 {strides = array<i32>} : memref<8x256xf32, #tpu.memory_space<vmem>>, vector<8x256xf32>,
    return
  }
  func.func @transform_0(%arg0: i32) -> (i32, i32) {
    %c0_i32 = arith.constant 0 : i32
    %c0_i32_0 = arith.constant 0 : i32
    return %arg0, %c0_i32 : i32, i32
  }
  func.func @transform_1(%arg0: i32) -> (i32, i32, i32) {
    %c0_i32 = arith.constant 0 : i32
    %c0_i32_0 = arith.constant 0 : i32
    %c0_i32_1 = arith.constant 0 : i32
    %c0_i32_2 = arith.constant 0 : i32
    return %c0_i32, %c0_i32_0, %c0_i32_1 : i32, i32, i32
  }
  func.func @transform_2(%arg0: i32) -> (i32, i32) {
    %c0_i32 = arith.constant 0 : i32
    %c0_i32_0 = arith.constant 0 : i32
    %c0_i32_1 = arith.constant 0 : i32
    return %c0_i32, %c0_i32_0 : i32, i32
  }
  func.func @transform_3(%arg0: i32) -> (i32, i32) {
    %c0_i32 = arith.constant 0 : i32
    %c0_i32_0 = arith.constant 0 : i32
    return %c0_i32, %arg0 : i32, i32
  }
}

</mosaic_0001>

<bundles_post_ra>
// kernel: tile.28
= control target key start
LH: loop header
LB: loop body
LE: loop exit
PB: predicated region body
PF: predicated region fallthrough
CT: control target
= control target key end

     0   :  { %s22_s0 = inlined_call_operand.vmem [shape: f32[16], index: 0, kind: input, shape index: {}]   ;;  %s23_s1 = inlined_call_operand.vmem [shape: f32[8,16], index: 1, kind: output, shape index: {}]  }
   0x1   :  { %v4_v0 = vld [vmem:[%s22_s0] ss:$0 sm:$0xff] }
   0x2   :  { %5 = vst [vmem:[%s23_s1] sm:$0xff] %v4_v0 }

// kernel: tile.45
= control target key start
LH: loop header
LB: loop body
LE: loop exit
PB: predicated region body
PF: predicated region fallthrough
CT: control target
= control target key end

     0   :  { %s69_s10 = smov 112   ;;  %s70_s11 = smov 80   ;;  %vm3_vm0 = vcmask 130048   ;;  %vm9_vm1 = vcmask 1048448   ;;  %vm15_vm2 = vcmask 917248   ;;  %vm21_vm3 = vcmask 786048   ;;  %s113_s0 = inlined_call_operand.vmem [shape: f32[8,16], index: 0, kind: input, shape index: {}]   ;;  %s114_s1 = inlined_call_operand.vmem [shape: f32[1,128], index: 1, kind: output, shape index: {}]  }
   0x1   :  { %v55_v0 = vld [vmem:[%s113_s0 + $0x7] sm:$0x1]   ;;  %v57_v1 = vld [vmem:[%s113_s0 + $0x5] sm:$0x1]   ;;  %v56_v2 = vld [vmem:[%s113_s0 + $0x6] sm:$0x1]  }
   0x2   :  { %7 = vrot.lane.b32.xlu0 %v55_v0, %s69_s10  ;;  %19 = vrot.lane.b32.xlu1 %v57_v1, %s70_s11  ;;  %v58_v3 = vld [vmem:[%s113_s0 + $0x4] sm:$0x1]   ;;  %v2_v4 = vld [vmem:[%s113_s0] sm:$0x1]   ;;  %s71_s18 = smov 96   ;;  %s72_s19 = smov 64  }
   0x3   :  { %4 = vst.msk [vmem:[#allocation0] sm:$0x1] %vm3_vm0, %v2_v4   ;;  %v59_v5 = vld [vmem:[%s113_s0 + $0x3] sm:$0x1]   ;;  %v60_v6 = vld [vmem:[%s113_s0 + $0x2] sm:$0x1]  }
   0x4   :  { %s73_s24 = smov 48   ;;  %s74_s25 = smov 32   ;;  %v61_v7 = vld [vmem:[%s113_s0 + $0x1] sm:$0x1]   ;;  %vm27_vm4 = vcmask 654848   ;;  %vm33_vm5 = vcmask 523648  }
   0x5   :  { %s75_s0 = smov 16   ;;  %vm39_vm6 = vcmask 392448   ;;  %vm45_vm7 = vcmask 261248  }
   0x6   :  { %13 = vrot.lane.b32.xlu0 %v56_v2, %s71_s18  ;;  %25 = vrot.lane.b32.xlu1 %v58_v3, %s72_s19 }
   0xa   :  { %31 = vrot.lane.b32.xlu0 %v59_v5, %s73_s24  ;;  %37 = vrot.lane.b32.xlu1 %v60_v6, %s74_s25 }
   0xe   :  { %43 = vrot.lane.b32.xlu0 %v61_v7, %s75_s0 }
  0x74   :  { %v8_v8 = vpop.permute.xlu0 %7   ;;  %v20_v9 = vpop.permute.xlu1 %19  }
  0x75   :  { %10 = vst.msk [vmem:[#allocation0] sm:$0x1] %vm9_vm1, %v8_v8  }
  0x78   :  { %v14_v10 = vpop.permute.xlu0 %13   ;;  %v26_v11 = vpop.permute.xlu1 %25  }
  0x79   :  { %16 = vst.msk [vmem:[#allocation0] sm:$0x1] %vm15_vm2, %v14_v10  }
  0x7a   :  { %22 = vst.msk [vmem:[#allocation0] sm:$0x1] %vm21_vm3, %v20_v9  }
  0x7b   :  { %28 = vst.msk [vmem:[#allocation0] sm:$0x1] %vm27_vm4, %v26_v11  }
  0x7c   :  { %v32_v12 = vpop.permute.xlu0 %31   ;;  %v38_v13 = vpop.permute.xlu1 %37  }
  0x7d   :  { %34 = vst.msk [vmem:[#allocation0] sm:$0x1] %vm33_vm5, %v32_v12  }
  0x7e   :  { %40 = vst.msk [vmem:[#allocation0] sm:$0x1] %vm39_vm6, %v38_v13  }
  0x80   :  { %v44_v14 = vpop.permute.xlu0 %43  }
  0x81   :  { %46 = vst.msk [vmem:[#allocation0] sm:$0x1] %vm45_vm7, %v44_v14  }
  0x88   :  { %v51_v15 = vld [vmem:[#allocation0] sm:$0x1] }
  0x89   :  { %54 = vst [vmem:[%s114_s1] sm:$0x1] %v51_v15 }

// kernel: _mlp_forward_impl.1
= control target key start
LH: loop header
LB: loop body
LE: loop exit
PB: predicated region body
PF: predicated region fallthrough
CT: control target
= control target key end

     0   :  { %s2733_s12 = smov 0   ;;  %s3144_s0 = inlined_call_operand.vmem [shape: bf16[512,128], index: 0, kind: input, shape index: {}]   ;;  %s3145_s1 = inlined_call_operand.vmem [shape: bf16[6,128,128], index: 1, kind: input, shape index: {}]   ;;  %s3146_s2 = inlined_call_operand.vmem [shape: f32[8,128], index: 2, kind: input, shape index: {}]   ;;  %s3147_s3 = inlined_call_operand.vmem [shape: f32[8,512], index: 3, kind: output, shape index: {}]  }
   0x1 LB: > { %s2045_s13 = sadd.s32 4294967295, %s2711_s12   ;;  %p2049_p0 = scmp.ge.s32.totalorder %s2711_s12, 1  ;;  %s2711_s12 = sphi %s2733_s12, %s13_s12  }
   0x2   : > { %p138_p1 = scmp.lt.s32.totalorder %s2711_s12, 3 }
   0x4   : > { %p139_p2 = pnand %p2049_p0, %p138_p1 }
   0x5   : > { %s2050_s16 = sshll.u32 (!%p139_p2), %s2045_s13, 5  ;;  %s2052_s19 = sshll.u32 (!%p139_p2), %s2045_s13, 1 }
   0x6   : > { %142 = sbr.rel (%p139_p2) target bundleno = 1429 (0x595), region = 32  ;;  %p163_p3 = scmp.lt.s32.totalorder (!%p139_p2), %s2050_s16, 63 }
   0x7   : > { %p169_p4 = scmp.lt.s32.totalorder (!%p139_p2), %s2052_s19, 3 }
   0xb   : > { %v2640_v0 = vld [vmem:[%s3145_s1 + $0x38] sm:$0xff]   ;;  %v2641_v1 = vld [vmem:[%s3145_s1 + $0x30] sm:$0xff]   ;;  %s3149_s16 = smov (!%p163_p3, %s2050_s16), 63  ;;  %v2642_v2 = vld [vmem:[%s3145_s1 + $0x28] sm:$0xff]   ;;  %v224_v39 = vlaneseq  ;;  %s3151_s19 = smov (!%p169_p4, %s2052_s19), 3 }
   0xc   : > { %2344 = vmatprep.subr.bf16.mxu0 %v2640_v0  ;;  %s2051_s21 = sshll.u32 %s3149_s16, 2  ;;  %v2643_v3 = vld [vmem:[%s3145_s1 + $0x20] sm:$0xff]   ;;  %v2644_v5 = vld [vmem:[%s3145_s1 + $0x18] sm:$0xff]   ;;  %v2645_v6 = vld [vmem:[%s3145_s1 + $0x10] sm:$0xff]   ;;  %s2053_s20 = sshll.u32 %s3151_s19, 3 }
   0xd   : > { %2345 = vmatpush3.bf16.msra.mxu0 %v2640_v0  ;;  %s2755_s24 = scalar_lea.vmem %s3144_s0, %s2051_s21  ;;  %v2646_v7 = vld [vmem:[%s3145_s1 + $0x8] sm:$0xff]   ;;  %v2647_v8 = vld [vmem:[%s3145_s1] sm:$0xff]   ;;  %v2664_v9 = vld [vmem:[%s3145_s1 + $0x78] sm:$0xff]   ;;  %v2833_v40 = vshrl.u32 %v224_v39, 7  ;;  %s172_s23 = scalar_lea.vmem %s3147_s3, %s2053_s20 }
   0xe   : > { %2346 = vmatprep.subr.bf16.mxu0 %v2641_v1  ;;  %v2648_v4 = vld [vmem:[%s2755_s24] sm:$0xff]   ;;  %v2665_v10 = vld [vmem:[%s3145_s1 + $0x70] sm:$0xff]   ;;  %2392 = vmatprep.subr.bf16.mxu1 %v2664_v9  ;;  %v2649_v11 = vld [vmem:[%s2755_s24 + $0x8] sm:$0xff]  }
   0xf   : > { %2360 = vmatprep.mubr.bf16.mxu0 %v2648_v4  ;;  %2393 = vmatpush3.bf16.msra.mxu1 %v2664_v9  ;;  %v2666_v12 = vld [vmem:[%s3145_s1 + $0x68] sm:$0xff]   ;;  %v2650_v13 = vld [vmem:[%s2755_s24 + $0x10] sm:$0xff]   ;;  %v2667_v14 = vld [vmem:[%s3145_s1 + $0x60] sm:$0xff]   ;;  %v226_v41 = vsub.s32 0, %v2833_v40 }
  0x10   : > { %2394 = vmatprep.subr.bf16.mxu1 %v2665_v10  ;;  %v2668_v15 = vld [vmem:[%s3145_s1 + $0x58] sm:$0xff]   ;;  %v2652_v17 = vld [vmem:[%s2755_s24 + $0x20] sm:$0xff]   ;;  %v2653_v18 = vld [vmem:[%s2755_s24 + $0x28] sm:$0xff]  }
  0x11   : > { %2347 = vmatpush3.bf16.msra.mxu0 %v2641_v1  ;;  %v2651_v16 = vld [vmem:[%s2755_s24 + $0x18] sm:$0xff]   ;;  %v2654_v19 = vld [vmem:[%s2755_s24 + $0x30] sm:$0xff]   ;;  %v2656_v21 = vld [vmem:[%s2755_s24 + $0x40] sm:$0xff]  }
  0x12   : > { %2348 = vmatprep.subr.bf16.mxu0 %v2642_v2  ;;  %v2655_v20 = vld [vmem:[%s2755_s24 + $0x38] sm:$0xff]   ;;  %v2657_v22 = vld [vmem:[%s2755_s24 + $0x48] sm:$0xff]   ;;  %v2658_v23 = vld [vmem:[%s2755_s24 + $0x50] sm:$0xff]  }
  0x13   : > { %2395 = vmatpush3.bf16.msra.mxu1 %v2665_v10  ;;  %v2659_v24 = vld [vmem:[%s2755_s24 + $0x58] sm:$0xff]   ;;  %v2660_v25 = vld [vmem:[%s2755_s24 + $0x60] sm:$0xff]   ;;  %v2661_v26 = vld [vmem:[%s2755_s24 + $0x68] sm:$0xff]  }
  0x14   : > { %2396 = vmatprep.subr.bf16.mxu1 %v2666_v12  ;;  %v2662_v27 = vld [vmem:[%s2755_s24 + $0x70] sm:$0xff]   ;;  %v2663_v28 = vld [vmem:[%s2755_s24 + $0x78] sm:$0xff]   ;;  %v2670_v30 = vld [vmem:[%s3145_s1 + $0x48] sm:$0xff]  }
  0x15   : > { %2349 = vmatpush3.bf16.msra.mxu0 %v2642_v2  ;;  %v2669_v29 = vld [vmem:[%s3145_s1 + $0x50] sm:$0xff]   ;;  %v2671_v31 = vld [vmem:[%s3145_s1 + $0x40] sm:$0xff]   ;;  %v2672_v32 = vld [vmem:[%s3145_s1 + $0xb8] sm:$0xff]  }
  0x16   : > { %2350 = vmatprep.subr.bf16.mxu0 %v2643_v3  ;;  %v2673_v33 = vld [vmem:[%s3145_s1 + $0xb0] sm:$0xff]   ;;  %v2674_v34 = vld [vmem:[%s3145_s1 + $0xa8] sm:$0xff]   ;;  %v2675_v35 = vld [vmem:[%s3145_s1 + $0xa0] sm:$0xff]  }
  0x17   : > { %2397 = vmatpush3.bf16.msra.mxu1 %v2666_v12  ;;  %v2676_v36 = vld [vmem:[%s3145_s1 + $0x98] sm:$0xff]   ;;  %v2677_v37 = vld [vmem:[%s3145_s1 + $0x90] sm:$0xff]   ;;  %v2678_v38 = vld [vmem:[%s3145_s1 + $0x88] sm:$0xff]  }
  0x18   : > { %2398 = vmatprep.subr.bf16.mxu1 %v2667_v14  ;;  %v2839_v42 = vld [vmem:[%s3146_s2] sm:$0xff] }
  0x19   : > { %2351 = vmatpush3.bf16.msra.mxu0 %v2643_v3  ;;  %v2842_v44 = vrot.slane %v2839_v42, %v226_v41 }
  0x1a   : > { %2352 = vmatprep.subr.bf16.mxu0 %v2644_v5 }
  0x1b   : > { %2399 = vmatpush3.bf16.msra.mxu1 %v2667_v14 }
  0x1c   : > { %2400 = vmatprep.subr.bf16.mxu1 %v2668_v15 }
  0x1d   : > { %2353 = vmatpush3.bf16.msra.mxu0 %v2644_v5 }
  0x1e   : > { %2354 = vmatprep.subr.bf16.mxu0 %v2645_v6 }
  0x1f   : > { %2401 = vmatpush3.bf16.msra.mxu1 %v2668_v15 }
  0x20   : > { %2402 = vmatprep.subr.bf16.mxu1 %v2669_v29 }
  0x21   : > { %2355 = vmatpush3.bf16.msra.mxu0 %v2645_v6 }
  0x22   : > { %2356 = vmatprep.subr.bf16.mxu0 %v2646_v7 }
  0x23   : > { %2403 = vmatpush3.bf16.msra.mxu1 %v2669_v29 }
  0x24   : > { %2404 = vmatprep.subr.bf16.mxu1 %v2670_v30 }
  0x25   : > { %2357 = vmatpush3.bf16.msra.mxu0 %v2646_v7 }
  0x26   : > { %2358 = vmatprep.subr.bf16.mxu0 %v2647_v8 }
  0x27   : > { %2405 = vmatpush3.bf16.msra.mxu1 %v2670_v30 }
  0x28   : > { %2406 = vmatprep.subr.bf16.mxu1 %v2671_v31 }
  0x29   : > { %2359 = vmatpush3.bf16.msra.mxu0 %v2647_v8 }
  0x2a   : > { %2440 = vmatprep.subr.bf16.mxu0 %v2672_v32 }
  0x2b   : > { %2407 = vmatpush3.bf16.msra.mxu1 %v2671_v31 }
  0x2c   : > { %2361 = vmatmul.mubr.bf16.vlgmr.msra.gmra.mxu0 %v2649_v11 }
  0x2d   : > { %2364 = vmatprep.mubr.bf16.mxu0 %v2650_v13  ;;  %2441 = vmatpush3.bf16.msra.mxu0 %v2672_v32 }
  0x2e   : > { %2442 = vmatprep.subr.bf16.mxu0 %v2673_v33 }
  0x31   : > { %2443 = vmatpush3.bf16.msra.mxu0 %v2673_v33 }
  0x32   : > { %2444 = vmatprep.subr.bf16.mxu0 %v2674_v34 }
  0x34   : > { %2365 = vmatmul.mubr.bf16.gmra.mxu0 %v2651_v16 }
  0x35   : > { %2368 = vmatprep.mubr.bf16.mxu0 %v2652_v17  ;;  %2445 = vmatpush3.bf16.msra.mxu0 %v2674_v34 }
  0x36   : > { %2446 = vmatprep.subr.bf16.mxu0 %v2675_v35 }
  0x39   : > { %2447 = vmatpush3.bf16.msra.mxu0 %v2675_v35 }
  0x3a   : > { %2448 = vmatprep.subr.bf16.mxu0 %v2676_v36 }
  0x3c   : > { %2369 = vmatmul.mubr.bf16.gmra.mxu0 %v2653_v18 }
  0x3d   : > { %2372 = vmatprep.mubr.bf16.mxu0 %v2654_v19  ;;  %2449 = vmatpush3.bf16.msra.mxu0 %v2676_v36 }
  0x3e   : > { %2450 = vmatprep.subr.bf16.mxu0 %v2677_v37 }
  0x41   : > { %2451 = vmatpush3.bf16.msra.mxu0 %v2677_v37 }
  0x42   : > { %2452 = vmatprep.subr.bf16.mxu0 %v2678_v38 }
  0x44   : > { %2373 = vmatmul.mubr.bf16.gmra.mxu0 %v2655_v20 }
  0x45   : > { %2376 = vmatprep.mubr.bf16.mxu0 %v2656_v21  ;;  %2453 = vmatpush3.bf16.msra.mxu0 %v2678_v38 }
  0x4c   : > { %2377 = vmatmul.mubr.bf16.gmra.mxu0 %v2657_v22 }
  0x4d   : > { %2380 = vmatprep.mubr.bf16.mxu0 %v2658_v23 }
  0x54   : > { %2381 = vmatmul.mubr.bf16.gmra.mxu0 %v2659_v24 }
  0x55   : > { %2384 = vmatprep.mubr.bf16.mxu0 %v2660_v25 }
  0x5c   : > { %2385 = vmatmul.mubr.bf16.gmra.mxu0 %v2661_v26 }
  0x5d   : > { %2388 = vmatprep.mubr.bf16.mxu0 %v2662_v27 }
  0x64   : > { %2389 = vmatmul.mubr.bf16.gmra.mxu0 %v2663_v28 }
  0xec   : > { %v2362_v43 = vpop.f32.mrf.mxu0 }
  0xed   : > { %v415_v49 = vadd.f32 %v2362_v43, %v2842_v44 }
  0xee   : > { %v406_v45 = vpop.f32.mrf.mxu0 }
  0xef   : > { %v407_v47 = vadd.f32 %v406_v45, %v2842_v44  ;;  %v535_v56 = vmax.f32 %v415_v49, 0.0 }
  0xf0   : > { %v2363_v46 = vpop.f32.mrf.mxu0 }
  0xf1   : > { %v418_v48 = vadd.f32 %v2363_v46, %v2842_v44  ;;  %v533_v54 = vmax.f32 %v407_v47, 0.0 }
  0xf2   : > { %v409_v50 = vpop.f32.mrf.mxu0 }
  0xf3   : > { %v410_v51 = vadd.f32 %v409_v50, %v2842_v44  ;;  %v536_v52 = vmax.f32 %v418_v48, 0.0 }
  0xf4   : > { %v2366_v53 = vpop.f32.mrf.mxu0 }
  0xf5   : > { %v534_v55 = vmax.f32 %v410_v51, 0.0  ;;  %v566_v59 = vpack.c.bf16 %v536_v52, %v535_v56  ;;  %v431_v63 = vadd.f32 %v2366_v53, %v2842_v44 }
  0xf6   : > { %v422_v57 = vpop.f32.mrf.mxu0 }
  0xf7   : > { %v565_v58 = vpack.c.bf16 %v534_v55, %v533_v54  ;;  %v423_v61 = vadd.f32 %v422_v57, %v2842_v44  ;;  %v539_v6 = vmax.f32 %v431_v63, 0.0 }
  0xf8   : > { %v2367_v60 = vpop.f32.mrf.mxu0 }
  0xf9   : > { %v434_v62 = vadd.f32 %v2367_v60, %v2842_v44  ;;  %2408 = vmatprep.mubr.bf16.mxu1 %v565_v58  ;;  %v537_v4 = vmax.f32 %v423_v61, 0.0 }
  0xfa   : > { %v425_v0 = vpop.f32.mrf.mxu0  ;;  %2409 = vmatmul.mubr.bf16.vlgmr.msra.gmra.mxu1 %v566_v59 }
  0xfb   : > { %v426_v1 = vadd.f32 %v425_v0, %v2842_v44  ;;  %v540_v2 = vmax.f32 %v434_v62, 0.0 }
  0xfc   : > { %v2370_v3 = vpop.f32.mrf.mxu0 }
  0xfd   : > { %v538_v5 = vmax.f32 %v426_v1, 0.0  ;;  %v568_v9 = vpack.c.bf16 %v540_v2, %v539_v6  ;;  %v447_v13 = vadd.f32 %v2370_v3, %v2842_v44 }
  0xfe   : > { %v438_v7 = vpop.f32.mrf.mxu0 }
  0xff   : > { %v567_v8 = vpack.c.bf16 %v538_v5, %v537_v4  ;;  %v439_v11 = vadd.f32 %v438_v7, %v2842_v44  ;;  %v543_v20 = vmax.f32 %v447_v13, 0.0 }
 0x100   : > { %v2371_v10 = vpop.f32.mrf.mxu0 }
 0x101   : > { %v450_v12 = vadd.f32 %v2371_v10, %v2842_v44  ;;  %2412 = vmatprep.mubr.bf16.mxu1 %v567_v8  ;;  %v541_v18 = vmax.f32 %v439_v11, 0.0 }
 0x102   : > { %v441_v14 = vpop.f32.mrf.mxu0  ;;  %2413 = vmatmul.mubr.bf16.gmra.mxu1 %v568_v9 }
 0x103   : > { %v442_v15 = vadd.f32 %v441_v14, %v2842_v44  ;;  %v544_v16 = vmax.f32 %v450_v12, 0.0 }
 0x104   : > { %v2374_v17 = vpop.f32.mrf.mxu0 }
 0x105   : > { %v542_v19 = vmax.f32 %v442_v15, 0.0  ;;  %v570_v23 = vpack.c.bf16 %v544_v16, %v543_v20  ;;  %v463_v27 = vadd.f32 %v2374_v17, %v2842_v44 }
 0x106   : > { %v454_v21 = vpop.f32.mrf.mxu0 }
 0x107   : > { %v569_v22 = vpack.c.bf16 %v542_v19, %v541_v18  ;;  %v455_v25 = vadd.f32 %v454_v21, %v2842_v44  ;;  %v547_v34 = vmax.f32 %v463_v27, 0.0 }
 0x108   : > { %v2375_v24 = vpop.f32.mrf.mxu0 }
 0x109   : > { %v466_v26 = vadd.f32 %v2375_v24, %v2842_v44  ;;  %2416 = vmatprep.mubr.bf16.mxu1 %v569_v22  ;;  %v545_v32 = vmax.f32 %v455_v25, 0.0 }
 0x10a   : > { %v457_v28 = vpop.f32.mrf.mxu0  ;;  %2417 = vmatmul.mubr.bf16.gmra.mxu1 %v570_v23 }
 0x10b   : > { %v458_v29 = vadd.f32 %v457_v28, %v2842_v44  ;;  %v548_v30 = vmax.f32 %v466_v26, 0.0 }
 0x10c   : > { %v2378_v31 = vpop.f32.mrf.mxu0 }
 0x10d   : > { %v546_v33 = vmax.f32 %v458_v29, 0.0  ;;  %v572_v37 = vpack.c.bf16 %v548_v30, %v547_v34  ;;  %v479_v43 = vadd.f32 %v2378_v31, %v2842_v44  ;;  %v2679_v31 = vld [vmem:[%s3145_s1 + $0x80] sm:$0xff]  }
 0x10e   : > { %v470_v35 = vpop.f32.mrf.mxu0  ;;  %2454 = vmatprep.subr.bf16.mxu0 %v2679_v31  ;;  %v2683_v34 = vld [vmem:[%s3145_s1 + $0xe0] sm:$0xff]  }
 0x10f   : > { %v571_v36 = vpack.c.bf16 %v546_v33, %v545_v32  ;;  %v471_v39 = vadd.f32 %v470_v35, %v2842_v44  ;;  %v551_v51 = vmax.f32 %v479_v43, 0.0  ;;  %2455 = vmatpush3.bf16.msra.mxu0 %v2679_v31  ;;  %v2680_v32 = vld [vmem:[%s3145_s1 + $0xf8] sm:$0xff]   ;;  %v2681_v33 = vld [vmem:[%s3145_s1 + $0xf0] sm:$0xff]  }
 0x110   : > { %v2379_v38 = vpop.f32.mrf.mxu0  ;;  %2488 = vmatprep.subr.bf16.mxu1 %v2680_v32  ;;  %v2684_v35 = vld [vmem:[%s3145_s1 + $0xd8] sm:$0xff]  }
 0x111   : > { %v482_v41 = vadd.f32 %v2379_v38, %v2842_v44  ;;  %2420 = vmatprep.mubr.bf16.mxu1 %v571_v36  ;;  %v549_v49 = vmax.f32 %v471_v39, 0.0  ;;  %2489 = vmatpush3.bf16.msra.mxu1 %v2680_v32  ;;  %v2685_v36 = vld [vmem:[%s3145_s1 + $0xd0] sm:$0xff]   ;;  %v600_v38 = vsub.s32 1, %v2833_v40 }
 0x112   : > { %v473_v45 = vpop.f32.mrf.mxu0  ;;  %2421 = vmatmul.mubr.bf16.gmra.mxu1 %v572_v37  ;;  %2490 = vmatprep.subr.bf16.mxu1 %v2681_v33  ;;  %v2686_v37 = vld [vmem:[%s3145_s1 + $0xc8] sm:$0xff]  }
 0x113   : > { %v474_v46 = vadd.f32 %v473_v45, %v2842_v44  ;;  %v552_v47 = vmax.f32 %v482_v41, 0.0  ;;  %v2902_v41 = vrot.slane %v2839_v42, %v600_v38 }
 0x114   : > { %v2382_v48 = vpop.f32.mrf.mxu0 }
 0x115   : > { %v550_v50 = vmax.f32 %v474_v46, 0.0  ;;  %v495_v52 = vadd.f32 %v2382_v48, %v2842_v44  ;;  %v574_v56 = vpack.c.bf16 %v552_v47, %v551_v51  ;;  %2491 = vmatpush3.bf16.msra.mxu1 %v2681_v33 }
 0x116   : > { %v486_v53 = vpop.f32.mrf.mxu0 }
 0x117   : > { %v573_v54 = vpack.c.bf16 %v550_v50, %v549_v49  ;;  %v487_v55 = vadd.f32 %v486_v53, %v2842_v44  ;;  %v555_v59 = vmax.f32 %v495_v52, 0.0 }
 0x118   : > { %v2383_v57 = vpop.f32.mrf.mxu0 }
 0x119   : > { %v498_v58 = vadd.f32 %v2383_v57, %v2842_v44  ;;  %2424 = vmatprep.mubr.bf16.mxu1 %v573_v54  ;;  %v553_v61 = vmax.f32 %v487_v55, 0.0 }
 0x11a   : > { %v489_v60 = vpop.f32.mrf.mxu0  ;;  %2425 = vmatmul.mubr.bf16.gmra.mxu1 %v574_v56 }
 0x11b   : > { %v556_v62 = vmax.f32 %v498_v58, 0.0  ;;  %v490_v63 = vadd.f32 %v489_v60, %v2842_v44 }
 0x11c   : > { %v2386_v0 = vpop.f32.mrf.mxu0 }
 0x11d   : > { %v554_v1 = vmax.f32 %v490_v63, 0.0  ;;  %v576_v2 = vpack.c.bf16 %v556_v62, %v555_v59  ;;  %v511_v3 = vadd.f32 %v2386_v0, %v2842_v44 }
 0x11e   : > { %v502_v4 = vpop.f32.mrf.mxu0 }
 0x11f   : > { %v575_v5 = vpack.c.bf16 %v554_v1, %v553_v61  ;;  %v503_v6 = vadd.f32 %v502_v4, %v2842_v44  ;;  %v559_v9 = vmax.f32 %v511_v3, 0.0 }
 0x120   : > { %v2387_v7 = vpop.f32.mrf.mxu0 }
 0x121   : > { %v514_v8 = vadd.f32 %v2387_v7, %v2842_v44  ;;  %2428 = vmatprep.mubr.bf16.mxu1 %v575_v5  ;;  %v557_v11 = vmax.f32 %v503_v6, 0.0 }
 0x122   : > { %v505_v10 = vpop.f32.mrf.mxu0  ;;  %2429 = vmatmul.mubr.bf16.gmra.mxu1 %v576_v2 }
 0x123   : > { %v560_v12 = vmax.f32 %v514_v8, 0.0  ;;  %v506_v13 = vadd.f32 %v505_v10, %v2842_v44 }
 0x124   : > { %v2390_v14 = vpop.f32.mrf.mxu0 }
 0x125   : > { %v558_v15 = vmax.f32 %v506_v13, 0.0  ;;  %v578_v16 = vpack.c.bf16 %v560_v12, %v559_v9  ;;  %v527_v17 = vadd.f32 %v2390_v14, %v2842_v44 }
 0x126   : > { %v518_v18 = vpop.f32.mrf.mxu0 }
 0x127   : > { %v577_v19 = vpack.c.bf16 %v558_v15, %v557_v11  ;;  %v519_v20 = vadd.f32 %v518_v18, %v2842_v44  ;;  %v563_v23 = vmax.f32 %v527_v17, 0.0 }
 0x128   : > { %v2391_v21 = vpop.f32.mrf.mxu0 }
 0x129   : > { %v530_v22 = vadd.f32 %v2391_v21, %v2842_v44  ;;  %2432 = vmatprep.mubr.bf16.mxu1 %v577_v19  ;;  %v561_v25 = vmax.f32 %v519_v20, 0.0 }
 0x12a   : > { %v521_v24 = vpop.f32.mrf.mxu0  ;;  %2433 = vmatmul.mubr.bf16.gmra.mxu1 %v578_v16 }
 0x12b   : > { %v564_v26 = vmax.f32 %v530_v22, 0.0  ;;  %v522_v27 = vadd.f32 %v521_v24, %v2842_v44  ;;  %v2682_v44 = vld [vmem:[%s3145_s1 + $0xe8] sm:$0xff]  }
 0x12c   : > { %2492 = vmatprep.subr.bf16.mxu1 %v2682_v44 }
 0x12d   : > { %v562_v28 = vmax.f32 %v522_v27, 0.0  ;;  %v580_v29 = vpack.c.bf16 %v564_v26, %v563_v23  ;;  %2493 = vmatpush3.bf16.msra.mxu1 %v2682_v44 }
 0x12e   : > { %2494 = vmatprep.subr.bf16.mxu1 %v2683_v34 }
 0x12f   : > { %v579_v30 = vpack.c.bf16 %v562_v28, %v561_v25 }
 0x131   : > { %2436 = vmatprep.mubr.bf16.mxu1 %v579_v30  ;;  %2495 = vmatpush3.bf16.msra.mxu1 %v2683_v34 }
 0x132   : > { %2437 = vmatmul.mubr.bf16.gmra.mxu1 %v580_v29  ;;  %2496 = vmatprep.subr.bf16.mxu1 %v2684_v35 }
 0x135   : > { %2497 = vmatpush3.bf16.msra.mxu1 %v2684_v35 }
 0x136   : > { %2498 = vmatprep.subr.bf16.mxu1 %v2685_v36 }
 0x139   : > { %2499 = vmatpush3.bf16.msra.mxu1 %v2685_v36 }
 0x13a   : > { %2500 = vmatprep.subr.bf16.mxu1 %v2686_v37 }
 0x13d   : > { %2501 = vmatpush3.bf16.msra.mxu1 %v2686_v37 }
 0x1ba   : > { %v2410_v39 = vpop.f32.mrf.mxu1 }
 0x1bb   : > { %v693_v48 = vadd.f32 %v2410_v39, %v2902_v41 }
 0x1bc   : > { %v684_v43 = vpop.f32.mrf.mxu1 }
 0x1bd   : > { %v685_v46 = vadd.f32 %v684_v43, %v2902_v41  ;;  %v813_v55 = vmax.f32 %v693_v48, 0.0 }
 0x1be   : > { %v2411_v45 = vpop.f32.mrf.mxu1 }
 0x1bf   : > { %v696_v47 = vadd.f32 %v2411_v45, %v2902_v41  ;;  %v811_v53 = vmax.f32 %v685_v46, 0.0 }
 0x1c0   : > { %v687_v49 = vpop.f32.mrf.mxu1 }
 0x1c1   : > { %v688_v50 = vadd.f32 %v687_v49, %v2902_v41  ;;  %v814_v51 = vmax.f32 %v696_v47, 0.0 }
 0x1c2   : > { %v2414_v52 = vpop.f32.mrf.mxu1 }
 0x1c3   : > { %v812_v54 = vmax.f32 %v688_v50, 0.0  ;;  %v844_v58 = vpack.c.bf16 %v814_v51, %v813_v55  ;;  %v709_v62 = vadd.f32 %v2414_v52, %v2902_v41 }
 0x1c4   : > { %v700_v56 = vpop.f32.mrf.mxu1 }
 0x1c5   : > { %v843_v57 = vpack.c.bf16 %v812_v54, %v811_v53  ;;  %v701_v60 = vadd.f32 %v700_v56, %v2902_v41  ;;  %v817_v5 = vmax.f32 %v709_v62, 0.0 }
 0x1c6   : > { %v2415_v59 = vpop.f32.mrf.mxu1 }
 0x1c7   : > { %v712_v61 = vadd.f32 %v2415_v59, %v2902_v41  ;;  %2456 = vmatprep.mubr.bf16.mxu0 %v843_v57  ;;  %v815_v3 = vmax.f32 %v701_v60, 0.0 }
 0x1c8   : > { %v703_v63 = vpop.f32.mrf.mxu1  ;;  %2457 = vmatmul.mubr.bf16.vlgmr.msra.gmra.mxu0 %v844_v58 }
 0x1c9   : > { %v704_v0 = vadd.f32 %v703_v63, %v2902_v41  ;;  %v818_v1 = vmax.f32 %v712_v61, 0.0 }
 0x1ca   : > { %v2418_v2 = vpop.f32.mrf.mxu1 }
 0x1cb   : > { %v816_v4 = vmax.f32 %v704_v0, 0.0  ;;  %v846_v8 = vpack.c.bf16 %v818_v1, %v817_v5  ;;  %v725_v12 = vadd.f32 %v2418_v2, %v2902_v41 }
 0x1cc   : > { %v716_v6 = vpop.f32.mrf.mxu1 }
 0x1cd   : > { %v845_v7 = vpack.c.bf16 %v816_v4, %v815_v3  ;;  %v717_v10 = vadd.f32 %v716_v6, %v2902_v41  ;;  %v821_v19 = vmax.f32 %v725_v12, 0.0 }
 0x1ce   : > { %v2419_v9 = vpop.f32.mrf.mxu1 }
 0x1cf   : > { %v728_v11 = vadd.f32 %v2419_v9, %v2902_v41  ;;  %2460 = vmatprep.mubr.bf16.mxu0 %v845_v7  ;;  %v819_v17 = vmax.f32 %v717_v10, 0.0 }
 0x1d0   : > { %v719_v13 = vpop.f32.mrf.mxu1  ;;  %2461 = vmatmul.mubr.bf16.gmra.mxu0 %v846_v8 }
 0x1d1   : > { %v720_v14 = vadd.f32 %v719_v13, %v2902_v41  ;;  %v822_v15 = vmax.f32 %v728_v11, 0.0 }
 0x1d2   : > { %v2422_v16 = vpop.f32.mrf.mxu1 }
 0x1d3   : > { %v820_v18 = vmax.f32 %v720_v14, 0.0  ;;  %v848_v22 = vpack.c.bf16 %v822_v15, %v821_v19  ;;  %v741_v26 = vadd.f32 %v2422_v16, %v2902_v41 }
 0x1d4   : > { %v732_v20 = vpop.f32.mrf.mxu1 }
 0x1d5   : > { %v847_v21 = vpack.c.bf16 %v820_v18, %v819_v17  ;;  %v733_v24 = vadd.f32 %v732_v20, %v2902_v41  ;;  %v825_v33 = vmax.f32 %v741_v26, 0.0 }
 0x1d6   : > { %v2423_v23 = vpop.f32.mrf.mxu1 }
 0x1d7   : > { %v744_v25 = vadd.f32 %v2423_v23, %v2902_v41  ;;  %2464 = vmatprep.mubr.bf16.mxu0 %v847_v21  ;;  %v823_v31 = vmax.f32 %v733_v24, 0.0 }
 0x1d8   : > { %v735_v27 = vpop.f32.mrf.mxu1  ;;  %2465 = vmatmul.mubr.bf16.gmra.mxu0 %v848_v22 }
 0x1d9   : > { %v736_v28 = vadd.f32 %v735_v27, %v2902_v41  ;;  %v826_v29 = vmax.f32 %v744_v25, 0.0 }
 0x1da   : > { %v2426_v30 = vpop.f32.mrf.mxu1 }
 0x1db   : > { %v824_v32 = vmax.f32 %v736_v28, 0.0  ;;  %v850_v35 = vpack.c.bf16 %v826_v29, %v825_v33  ;;  %v757_v39 = vadd.f32 %v2426_v30, %v2902_v41  ;;  %v2687_v30 = vld [vmem:[%s3145_s1 + $0xc0] sm:$0xff]  }
 0x1dc   : > { %v748_v44 = vpop.f32.mrf.mxu1  ;;  %2502 = vmatprep.subr.bf16.mxu1 %v2687_v30  ;;  %v2691_v33 = vld [vmem:[%s3145_s1 + $0x120] sm:$0xff]  }
 0x1dd   : > { %v849_v34 = vpack.c.bf16 %v824_v32, %v823_v31  ;;  %v749_v37 = vadd.f32 %v748_v44, %v2902_v41  ;;  %v829_v50 = vmax.f32 %v757_v39, 0.0  ;;  %2503 = vmatpush3.bf16.msra.mxu1 %v2687_v30  ;;  %v2688_v31 = vld [vmem:[%s3145_s1 + $0x138] sm:$0xff]   ;;  %v2689_v32 = vld [vmem:[%s3145_s1 + $0x130] sm:$0xff]  }
 0x1de   : > { %v2427_v36 = vpop.f32.mrf.mxu1  ;;  %2536 = vmatprep.subr.bf16.mxu0 %v2688_v31  ;;  %v2692_v44 = vld [vmem:[%s3145_s1 + $0x118] sm:$0xff]  }
 0x1df   : > { %v760_v38 = vadd.f32 %v2427_v36, %v2902_v41  ;;  %2468 = vmatprep.mubr.bf16.mxu0 %v849_v34  ;;  %v827_v48 = vmax.f32 %v749_v37, 0.0  ;;  %2537 = vmatpush3.bf16.msra.mxu0 %v2688_v31  ;;  %v2693_v34 = vld [vmem:[%s3145_s1 + $0x110] sm:$0xff]   ;;  %v878_v36 = vsub.s32 2, %v2833_v40 }
 0x1e0   : > { %v751_v43 = vpop.f32.mrf.mxu1  ;;  %2469 = vmatmul.mubr.bf16.gmra.mxu0 %v850_v35  ;;  %2538 = vmatprep.subr.bf16.mxu0 %v2689_v32  ;;  %v2694_v35 = vld [vmem:[%s3145_s1 + $0x108] sm:$0xff]  }
 0x1e1   : > { %v752_v45 = vadd.f32 %v751_v43, %v2902_v41  ;;  %v830_v46 = vmax.f32 %v760_v38, 0.0  ;;  %v2962_v38 = vrot.slane %v2839_v42, %v878_v36 }
 0x1e2   : > { %v2430_v47 = vpop.f32.mrf.mxu1 }
 0x1e3   : > { %v828_v49 = vmax.f32 %v752_v45, 0.0  ;;  %v852_v53 = vpack.c.bf16 %v830_v46, %v829_v50  ;;  %v773_v57 = vadd.f32 %v2430_v47, %v2902_v41  ;;  %2539 = vmatpush3.bf16.msra.mxu0 %v2689_v32 }
 0x1e4   : > { %v764_v51 = vpop.f32.mrf.mxu1 }
 0x1e5   : > { %v851_v52 = vpack.c.bf16 %v828_v49, %v827_v48  ;;  %v765_v55 = vadd.f32 %v764_v51, %v2902_v41  ;;  %v833_v0 = vmax.f32 %v773_v57, 0.0 }
 0x1e6   : > { %v2431_v54 = vpop.f32.mrf.mxu1 }
 0x1e7   : > { %v776_v56 = vadd.f32 %v2431_v54, %v2902_v41  ;;  %2472 = vmatprep.mubr.bf16.mxu0 %v851_v52  ;;  %v831_v62 = vmax.f32 %v765_v55, 0.0 }
 0x1e8   : > { %v767_v58 = vpop.f32.mrf.mxu1  ;;  %2473 = vmatmul.mubr.bf16.gmra.mxu0 %v852_v53 }
 0x1e9   : > { %v768_v59 = vadd.f32 %v767_v58, %v2902_v41  ;;  %v834_v60 = vmax.f32 %v776_v56, 0.0 }
 0x1ea   : > { %v2434_v61 = vpop.f32.mrf.mxu1 }
 0x1eb   : > { %v832_v63 = vmax.f32 %v768_v59, 0.0  ;;  %v789_v1 = vadd.f32 %v2434_v61, %v2902_v41  ;;  %v854_v5 = vpack.c.bf16 %v834_v60, %v833_v0 }
 0x1ec   : > { %v780_v2 = vpop.f32.mrf.mxu1 }
 0x1ed   : > { %v853_v3 = vpack.c.bf16 %v832_v63, %v831_v62  ;;  %v781_v4 = vadd.f32 %v780_v2, %v2902_v41  ;;  %v837_v8 = vmax.f32 %v789_v1, 0.0 }
 0x1ee   : > { %v2435_v6 = vpop.f32.mrf.mxu1 }
 0x1ef   : > { %v792_v7 = vadd.f32 %v2435_v6, %v2902_v41  ;;  %2476 = vmatprep.mubr.bf16.mxu0 %v853_v3  ;;  %v835_v10 = vmax.f32 %v781_v4, 0.0 }
 0x1f0   : > { %v783_v9 = vpop.f32.mrf.mxu1  ;;  %2477 = vmatmul.mubr.bf16.gmra.mxu0 %v854_v5 }
 0x1f1   : > { %v838_v11 = vmax.f32 %v792_v7, 0.0  ;;  %v784_v12 = vadd.f32 %v783_v9, %v2902_v41 }
 0x1f2   : > { %v2438_v13 = vpop.f32.mrf.mxu1 }
 0x1f3   : > { %v836_v14 = vmax.f32 %v784_v12, 0.0  ;;  %v856_v15 = vpack.c.bf16 %v838_v11, %v837_v8  ;;  %v805_v16 = vadd.f32 %v2438_v13, %v2902_v41 }
 0x1f4   : > { %v796_v17 = vpop.f32.mrf.mxu1 }
 0x1f5   : > { %v855_v18 = vpack.c.bf16 %v836_v14, %v835_v10  ;;  %v797_v19 = vadd.f32 %v796_v17, %v2902_v41  ;;  %v841_v22 = vmax.f32 %v805_v16, 0.0 }
 0x1f6   : > { %v2439_v20 = vpop.f32.mrf.mxu1 }
 0x1f7   : > { %v808_v21 = vadd.f32 %v2439_v20, %v2902_v41  ;;  %2480 = vmatprep.mubr.bf16.mxu0 %v855_v18  ;;  %v839_v24 = vmax.f32 %v797_v19, 0.0 }
 0x1f8   : > { %v799_v23 = vpop.f32.mrf.mxu1  ;;  %2481 = vmatmul.mubr.bf16.gmra.mxu0 %v856_v15 }
 0x1f9   : > { %v842_v25 = vmax.f32 %v808_v21, 0.0  ;;  %v800_v26 = vadd.f32 %v799_v23, %v2902_v41  ;;  %v2690_v41 = vld [vmem:[%s3145_s1 + $0x128] sm:$0xff]  }
 0x1fa   : > { %2540 = vmatprep.subr.bf16.mxu0 %v2690_v41 }
 0x1fb   : > { %v840_v27 = vmax.f32 %v800_v26, 0.0  ;;  %v858_v28 = vpack.c.bf16 %v842_v25, %v841_v22  ;;  %2541 = vmatpush3.bf16.msra.mxu0 %v2690_v41 }
 0x1fc   : > { %2542 = vmatprep.subr.bf16.mxu0 %v2691_v33 }
 0x1fd   : > { %v857_v29 = vpack.c.bf16 %v840_v27, %v839_v24 }
 0x1ff   : > { %2484 = vmatprep.mubr.bf16.mxu0 %v857_v29  ;;  %2543 = vmatpush3.bf16.msra.mxu0 %v2691_v33 }
 0x200   : > { %2485 = vmatmul.mubr.bf16.gmra.mxu0 %v858_v28  ;;  %2544 = vmatprep.subr.bf16.mxu0 %v2692_v44 }
 0x203   : > { %2545 = vmatpush3.bf16.msra.mxu0 %v2692_v44 }
 0x204   : > { %2546 = vmatprep.subr.bf16.mxu0 %v2693_v34 }
 0x207   : > { %2547 = vmatpush3.bf16.msra.mxu0 %v2693_v34 }
 0x208   : > { %2548 = vmatprep.subr.bf16.mxu0 %v2694_v35 }
 0x20b   : > { %2549 = vmatpush3.bf16.msra.mxu0 %v2694_v35 }
 0x288   : > { %v2458_v37 = vpop.f32.mrf.mxu0 }
 0x289   : > { %v971_v47 = vadd.f32 %v2458_v37, %v2962_v38 }
 0x28a   : > { %v962_v39 = vpop.f32.mrf.mxu0 }
 0x28b   : > { %v963_v45 = vadd.f32 %v962_v39, %v2962_v38  ;;  %v1091_v54 = vmax.f32 %v971_v47, 0.0 }
 0x28c   : > { %v2459_v43 = vpop.f32.mrf.mxu0 }
 0x28d   : > { %v974_v46 = vadd.f32 %v2459_v43, %v2962_v38  ;;  %v1089_v52 = vmax.f32 %v963_v45, 0.0 }
 0x28e   : > { %v965_v48 = vpop.f32.mrf.mxu0 }
 0x28f   : > { %v966_v49 = vadd.f32 %v965_v48, %v2962_v38  ;;  %v1092_v50 = vmax.f32 %v974_v46, 0.0 }
 0x290   : > { %v2462_v51 = vpop.f32.mrf.mxu0 }
 0x291   : > { %v1090_v53 = vmax.f32 %v966_v49, 0.0  ;;  %v1122_v57 = vpack.c.bf16 %v1092_v50, %v1091_v54  ;;  %v987_v61 = vadd.f32 %v2462_v51, %v2962_v38 }
 0x292   : > { %v978_v55 = vpop.f32.mrf.mxu0 }
 0x293   : > { %v1121_v56 = vpack.c.bf16 %v1090_v53, %v1089_v52  ;;  %v979_v59 = vadd.f32 %v978_v55, %v2962_v38  ;;  %v1095_v4 = vmax.f32 %v987_v61, 0.0 }
 0x294   : > { %v2463_v58 = vpop.f32.mrf.mxu0 }
 0x295   : > { %v990_v60 = vadd.f32 %v2463_v58, %v2962_v38  ;;  %2504 = vmatprep.mubr.bf16.mxu1 %v1121_v56  ;;  %v1093_v2 = vmax.f32 %v979_v59, 0.0 }
 0x296   : > { %v981_v62 = vpop.f32.mrf.mxu0  ;;  %2505 = vmatmul.mubr.bf16.vlgmr.msra.gmra.mxu1 %v1122_v57 }
 0x297   : > { %v982_v63 = vadd.f32 %v981_v62, %v2962_v38  ;;  %v1096_v0 = vmax.f32 %v990_v60, 0.0 }
 0x298   : > { %v2466_v1 = vpop.f32.mrf.mxu0 }
 0x299   : > { %v1094_v3 = vmax.f32 %v982_v63, 0.0  ;;  %v1124_v7 = vpack.c.bf16 %v1096_v0, %v1095_v4  ;;  %v1003_v11 = vadd.f32 %v2466_v1, %v2962_v38 }
 0x29a   : > { %v994_v5 = vpop.f32.mrf.mxu0 }
 0x29b   : > { %v1123_v6 = vpack.c.bf16 %v1094_v3, %v1093_v2  ;;  %v995_v9 = vadd.f32 %v994_v5, %v2962_v38  ;;  %v1099_v18 = vmax.f32 %v1003_v11, 0.0 }
 0x29c   : > { %v2467_v8 = vpop.f32.mrf.mxu0 }
 0x29d   : > { %v1006_v10 = vadd.f32 %v2467_v8, %v2962_v38  ;;  %2508 = vmatprep.mubr.bf16.mxu1 %v1123_v6  ;;  %v1097_v16 = vmax.f32 %v995_v9, 0.0 }
 0x29e   : > { %v997_v12 = vpop.f32.mrf.mxu0  ;;  %2509 = vmatmul.mubr.bf16.gmra.mxu1 %v1124_v7 }
 0x29f   : > { %v998_v13 = vadd.f32 %v997_v12, %v2962_v38  ;;  %v1100_v14 = vmax.f32 %v1006_v10, 0.0 }
 0x2a0   : > { %v2470_v15 = vpop.f32.mrf.mxu0 }
 0x2a1   : > { %v1098_v17 = vmax.f32 %v998_v13, 0.0  ;;  %v1126_v21 = vpack.c.bf16 %v1100_v14, %v1099_v18  ;;  %v1019_v25 = vadd.f32 %v2470_v15, %v2962_v38 }
 0x2a2   : > { %v1010_v19 = vpop.f32.mrf.mxu0 }
 0x2a3   : > { %v1125_v20 = vpack.c.bf16 %v1098_v17, %v1097_v16  ;;  %v1011_v23 = vadd.f32 %v1010_v19, %v2962_v38  ;;  %v1103_v32 = vmax.f32 %v1019_v25, 0.0 }
 0x2a4   : > { %v2471_v22 = vpop.f32.mrf.mxu0 }
 0x2a5   : > { %v1022_v24 = vadd.f32 %v2471_v22, %v2962_v38  ;;  %2512 = vmatprep.mubr.bf16.mxu1 %v1125_v20  ;;  %v1101_v30 = vmax.f32 %v1011_v23, 0.0 }
 0x2a6   : > { %v1013_v26 = vpop.f32.mrf.mxu0  ;;  %2513 = vmatmul.mubr.bf16.gmra.mxu1 %v1126_v21 }
 0x2a7   : > { %v1014_v27 = vadd.f32 %v1013_v26, %v2962_v38  ;;  %v1104_v28 = vmax.f32 %v1022_v24, 0.0 }
 0x2a8   : > { %v2474_v29 = vpop.f32.mrf.mxu0 }
 0x2a9   : > { %v1102_v31 = vmax.f32 %v1014_v27, 0.0  ;;  %v1128_v44 = vpack.c.bf16 %v1104_v28, %v1103_v32  ;;  %v1035_v37 = vadd.f32 %v2474_v29, %v2962_v38  ;;  %v2695_v29 = vld [vmem:[%s3145_s1 + $0x100] sm:$0xff]  }
 0x2aa   : > { %v1026_v41 = vpop.f32.mrf.mxu0  ;;  %2550 = vmatprep.subr.bf16.mxu0 %v2695_v29  ;;  %v2699_v32 = vld [vmem:[%s3145_s1 + $0x160] sm:$0xff]  }
 0x2ab   : > { %v1127_v33 = vpack.c.bf16 %v1102_v31, %v1101_v30  ;;  %v1027_v35 = vadd.f32 %v1026_v41, %v2962_v38  ;;  %v1107_v49 = vmax.f32 %v1035_v37, 0.0  ;;  %2551 = vmatpush3.bf16.msra.mxu0 %v2695_v29  ;;  %v2696_v30 = vld [vmem:[%s3145_s1 + $0x178] sm:$0xff]   ;;  %v2697_v31 = vld [vmem:[%s3145_s1 + $0x170] sm:$0xff]  }
 0x2ac   : > { %v2475_v34 = vpop.f32.mrf.mxu0  ;;  %2584 = vmatprep.subr.bf16.mxu1 %v2696_v30  ;;  %v2700_v41 = vld [vmem:[%s3145_s1 + $0x158] sm:$0xff]  }
 0x2ad   : > { %v1038_v36 = vadd.f32 %v2475_v34, %v2962_v38  ;;  %2516 = vmatprep.mubr.bf16.mxu1 %v1127_v33  ;;  %v1105_v47 = vmax.f32 %v1027_v35, 0.0  ;;  %2585 = vmatpush3.bf16.msra.mxu1 %v2696_v30  ;;  %v2701_v33 = vld [vmem:[%s3145_s1 + $0x150] sm:$0xff]   ;;  %v1156_v34 = vsub.s32 3, %v2833_v40 }
 0x2ae   : > { %v1029_v39 = vpop.f32.mrf.mxu0  ;;  %2517 = vmatmul.mubr.bf16.gmra.mxu1 %v1128_v44  ;;  %2586 = vmatprep.subr.bf16.mxu1 %v2697_v31  ;;  %v2702_v44 = vld [vmem:[%s3145_s1 + $0x148] sm:$0xff]  }
 0x2af   : > { %v1030_v43 = vadd.f32 %v1029_v39, %v2962_v38  ;;  %v1108_v45 = vmax.f32 %v1038_v36, 0.0  ;;  %v3022_v36 = vrot.slane %v2839_v42, %v1156_v34 }
 0x2b0   : > { %v2478_v46 = vpop.f32.mrf.mxu0 }
 0x2b1   : > { %v1106_v48 = vmax.f32 %v1030_v43, 0.0  ;;  %v1130_v52 = vpack.c.bf16 %v1108_v45, %v1107_v49  ;;  %v1051_v56 = vadd.f32 %v2478_v46, %v2962_v38  ;;  %2587 = vmatpush3.bf16.msra.mxu1 %v2697_v31 }
 0x2b2   : > { %v1042_v50 = vpop.f32.mrf.mxu0 }
 0x2b3   : > { %v1129_v51 = vpack.c.bf16 %v1106_v48, %v1105_v47  ;;  %v1043_v54 = vadd.f32 %v1042_v50, %v2962_v38  ;;  %v1111_v63 = vmax.f32 %v1051_v56, 0.0 }
 0x2b4   : > { %v2479_v53 = vpop.f32.mrf.mxu0 }
 0x2b5   : > { %v1054_v55 = vadd.f32 %v2479_v53, %v2962_v38  ;;  %2520 = vmatprep.mubr.bf16.mxu1 %v1129_v51  ;;  %v1109_v61 = vmax.f32 %v1043_v54, 0.0 }
 0x2b6   : > { %v1045_v57 = vpop.f32.mrf.mxu0  ;;  %2521 = vmatmul.mubr.bf16.gmra.mxu1 %v1130_v52 }
 0x2b7   : > { %v1046_v58 = vadd.f32 %v1045_v57, %v2962_v38  ;;  %v1112_v59 = vmax.f32 %v1054_v55, 0.0 }
 0x2b8   : > { %v2482_v60 = vpop.f32.mrf.mxu0 }
 0x2b9   : > { %v1110_v62 = vmax.f32 %v1046_v58, 0.0  ;;  %v1132_v2 = vpack.c.bf16 %v1112_v59, %v1111_v63  ;;  %v1067_v6 = vadd.f32 %v2482_v60, %v2962_v38 }
 0x2ba   : > { %v1058_v0 = vpop.f32.mrf.mxu0 }
 0x2bb   : > { %v1131_v1 = vpack.c.bf16 %v1110_v62, %v1109_v61  ;;  %v1059_v4 = vadd.f32 %v1058_v0, %v2962_v38  ;;  %v1115_v13 = vmax.f32 %v1067_v6, 0.0 }
 0x2bc   : > { %v2483_v3 = vpop.f32.mrf.mxu0 }
 0x2bd   : > { %v1070_v5 = vadd.f32 %v2483_v3, %v2962_v38  ;;  %2524 = vmatprep.mubr.bf16.mxu1 %v1131_v1  ;;  %v1113_v11 = vmax.f32 %v1059_v4, 0.0 }
 0x2be   : > { %v1061_v7 = vpop.f32.mrf.mxu0  ;;  %2525 = vmatmul.mubr.bf16.gmra.mxu1 %v1132_v2 }
 0x2bf   : > { %v1062_v8 = vadd.f32 %v1061_v7, %v2962_v38  ;;  %v1116_v9 = vmax.f32 %v1070_v5, 0.0 }
 0x2c0   : > { %v2486_v10 = vpop.f32.mrf.mxu0 }
 0x2c1   : > { %v1114_v12 = vmax.f32 %v1062_v8, 0.0  ;;  %v1083_v14 = vadd.f32 %v2486_v10, %v2962_v38  ;;  %v1134_v18 = vpack.c.bf16 %v1116_v9, %v1115_v13 }
 0x2c2   : > { %v1074_v15 = vpop.f32.mrf.mxu0 }
 0x2c3   : > { %v1133_v16 = vpack.c.bf16 %v1114_v12, %v1113_v11  ;;  %v1075_v17 = vadd.f32 %v1074_v15, %v2962_v38  ;;  %v1119_v21 = vmax.f32 %v1083_v14, 0.0 }
 0x2c4   : > { %v2487_v19 = vpop.f32.mrf.mxu0 }
 0x2c5   : > { %v1086_v20 = vadd.f32 %v2487_v19, %v2962_v38  ;;  %2528 = vmatprep.mubr.bf16.mxu1 %v1133_v16  ;;  %v1117_v23 = vmax.f32 %v1075_v17, 0.0 }
 0x2c6   : > { %v1077_v22 = vpop.f32.mrf.mxu0  ;;  %2529 = vmatmul.mubr.bf16.gmra.mxu1 %v1134_v18 }
 0x2c7   : > { %v1120_v24 = vmax.f32 %v1086_v20, 0.0  ;;  %v1078_v25 = vadd.f32 %v1077_v22, %v2962_v38  ;;  %v2698_v38 = vld [vmem:[%s3145_s1 + $0x168] sm:$0xff]  }
 0x2c8   : > { %2588 = vmatprep.subr.bf16.mxu1 %v2698_v38 }
 0x2c9   : > { %v1118_v26 = vmax.f32 %v1078_v25, 0.0  ;;  %v1136_v27 = vpack.c.bf16 %v1120_v24, %v1119_v21  ;;  %2589 = vmatpush3.bf16.msra.mxu1 %v2698_v38 }
 0x2ca   : > { %2590 = vmatprep.subr.bf16.mxu1 %v2699_v32 }
 0x2cb   : > { %v1135_v28 = vpack.c.bf16 %v1118_v26, %v1117_v23 }
 0x2cd   : > { %2532 = vmatprep.mubr.bf16.mxu1 %v1135_v28  ;;  %2591 = vmatpush3.bf16.msra.mxu1 %v2699_v32 }
 0x2ce   : > { %2533 = vmatmul.mubr.bf16.gmra.mxu1 %v1136_v27  ;;  %2592 = vmatprep.subr.bf16.mxu1 %v2700_v41 }
 0x2d1   : > { %2593 = vmatpush3.bf16.msra.mxu1 %v2700_v41 }
 0x2d2   : > { %2594 = vmatprep.subr.bf16.mxu1 %v2701_v33 }
 0x2d5   : > { %2595 = vmatpush3.bf16.msra.mxu1 %v2701_v33 }
 0x2d6   : > { %2596 = vmatprep.subr.bf16.mxu1 %v2702_v44 }
 0x2d9   : > { %2597 = vmatpush3.bf16.msra.mxu1 %v2702_v44 }
 0x356   : > { %v2506_v35 = vpop.f32.mrf.mxu1 }
 0x357   : > { %v1249_v46 = vadd.f32 %v2506_v35, %v3022_v36 }
 0x358   : > { %v1240_v37 = vpop.f32.mrf.mxu1 }
 0x359   : > { %v1241_v43 = vadd.f32 %v1240_v37, %v3022_v36  ;;  %v1369_v53 = vmax.f32 %v1249_v46, 0.0 }
 0x35a   : > { %v2507_v39 = vpop.f32.mrf.mxu1 }
 0x35b   : > { %v1252_v45 = vadd.f32 %v2507_v39, %v3022_v36  ;;  %v1367_v51 = vmax.f32 %v1241_v43, 0.0 }
 0x35c   : > { %v1243_v47 = vpop.f32.mrf.mxu1 }
 0x35d   : > { %v1244_v48 = vadd.f32 %v1243_v47, %v3022_v36  ;;  %v1370_v49 = vmax.f32 %v1252_v45, 0.0 }
 0x35e   : > { %v2510_v50 = vpop.f32.mrf.mxu1 }
 0x35f   : > { %v1368_v52 = vmax.f32 %v1244_v48, 0.0  ;;  %v1400_v42 = vpack.c.bf16 %v1370_v49, %v1369_v53  ;;  %v1265_v59 = vadd.f32 %v2510_v50, %v3022_v36 }
 0x360   : > { %v1256_v54 = vpop.f32.mrf.mxu1 }
 0x361   : > { %v1399_v55 = vpack.c.bf16 %v1368_v52, %v1367_v51  ;;  %v1257_v57 = vadd.f32 %v1256_v54, %v3022_v36  ;;  %v1373_v2 = vmax.f32 %v1265_v59, 0.0 }
 0x362   : > { %v2511_v56 = vpop.f32.mrf.mxu1 }
 0x363   : > { %v1268_v58 = vadd.f32 %v2511_v56, %v3022_v36  ;;  %2552 = vmatprep.mubr.bf16.mxu0 %v1399_v55  ;;  %v1371_v0 = vmax.f32 %v1257_v57, 0.0 }
 0x364   : > { %v1259_v60 = vpop.f32.mrf.mxu1  ;;  %2553 = vmatmul.mubr.bf16.vlgmr.msra.gmra.mxu0 %v1400_v42 }
 0x365   : > { %v1260_v61 = vadd.f32 %v1259_v60, %v3022_v36  ;;  %v1374_v62 = vmax.f32 %v1268_v58, 0.0 }
 0x366   : > { %v2514_v63 = vpop.f32.mrf.mxu1 }
 0x367   : > { %v1372_v1 = vmax.f32 %v1260_v61, 0.0  ;;  %v1402_v5 = vpack.c.bf16 %v1374_v62, %v1373_v2  ;;  %v1281_v9 = vadd.f32 %v2514_v63, %v3022_v36 }
 0x368   : > { %v1272_v3 = vpop.f32.mrf.mxu1 }
 0x369   : > { %v1401_v4 = vpack.c.bf16 %v1372_v1, %v1371_v0  ;;  %v1273_v7 = vadd.f32 %v1272_v3, %v3022_v36  ;;  %v1377_v16 = vmax.f32 %v1281_v9, 0.0 }
 0x36a   : > { %v2515_v6 = vpop.f32.mrf.mxu1 }
 0x36b   : > { %v1284_v8 = vadd.f32 %v2515_v6, %v3022_v36  ;;  %2556 = vmatprep.mubr.bf16.mxu0 %v1401_v4  ;;  %v1375_v14 = vmax.f32 %v1273_v7, 0.0 }
 0x36c   : > { %v1275_v10 = vpop.f32.mrf.mxu1  ;;  %2557 = vmatmul.mubr.bf16.gmra.mxu0 %v1402_v5 }
 0x36d   : > { %v1276_v11 = vadd.f32 %v1275_v10, %v3022_v36  ;;  %v1378_v12 = vmax.f32 %v1284_v8, 0.0 }
 0x36e   : > { %v2518_v13 = vpop.f32.mrf.mxu1 }
 0x36f   : > { %v1376_v15 = vmax.f32 %v1276_v11, 0.0  ;;  %v1404_v19 = vpack.c.bf16 %v1378_v12, %v1377_v16  ;;  %v1297_v23 = vadd.f32 %v2518_v13, %v3022_v36 }
 0x370   : > { %v1288_v17 = vpop.f32.mrf.mxu1 }
 0x371   : > { %v1403_v18 = vpack.c.bf16 %v1376_v15, %v1375_v14  ;;  %v1289_v21 = vadd.f32 %v1288_v17, %v3022_v36  ;;  %v1381_v30 = vmax.f32 %v1297_v23, 0.0 }
 0x372   : > { %v2519_v20 = vpop.f32.mrf.mxu1 }
 0x373   : > { %v1300_v22 = vadd.f32 %v2519_v20, %v3022_v36  ;;  %2560 = vmatprep.mubr.bf16.mxu0 %v1403_v18  ;;  %v1379_v28 = vmax.f32 %v1289_v21, 0.0 }
 0x374   : > { %v1291_v24 = vpop.f32.mrf.mxu1  ;;  %2561 = vmatmul.mubr.bf16.gmra.mxu0 %v1404_v19 }
 0x375   : > { %v1292_v25 = vadd.f32 %v1291_v24, %v3022_v36  ;;  %v1382_v26 = vmax.f32 %v1300_v22, 0.0 }
 0x376   : > { %v2522_v27 = vpop.f32.mrf.mxu1 }
 0x377   : > { %v1380_v29 = vmax.f32 %v1292_v25, 0.0  ;;  %v1406_v32 = vpack.c.bf16 %v1382_v26, %v1381_v30  ;;  %v1313_v34 = vadd.f32 %v2522_v27, %v3022_v36  ;;  %v2703_v26 = vld [vmem:[%s3145_s1 + $0x140] sm:$0xff]   ;;  %v1434_v27 = vsub.s32 4, %v2833_v40 }
 0x378   : > { %v1304_v31 = vpop.f32.mrf.mxu1  ;;  %2598 = vmatprep.subr.bf16.mxu1 %v2703_v26 }
 0x379   : > { %v1405_v38 = vpack.c.bf16 %v1380_v29, %v1379_v28  ;;  %v1305_v33 = vadd.f32 %v1304_v31, %v3022_v36  ;;  %v1385_v47 = vmax.f32 %v1313_v34, 0.0  ;;  %2599 = vmatpush3.bf16.msra.mxu1 %v2703_v26 }
 0x37a   : > { %v2523_v41 = vpop.f32.mrf.mxu1 }
 0x37b   : > { %v1316_v44 = vadd.f32 %v2523_v41, %v3022_v36  ;;  %2564 = vmatprep.mubr.bf16.mxu0 %v1405_v38  ;;  %v1383_v45 = vmax.f32 %v1305_v33, 0.0 }
 0x37c   : > { %v1307_v35 = vpop.f32.mrf.mxu1  ;;  %2565 = vmatmul.mubr.bf16.gmra.mxu0 %v1406_v32 }
 0x37d   : > { %v1308_v37 = vadd.f32 %v1307_v35, %v3022_v36  ;;  %v1386_v39 = vmax.f32 %v1316_v44, 0.0 }
 0x37e   : > { %v2526_v43 = vpop.f32.mrf.mxu1 }
 0x37f   : > { %v1384_v46 = vmax.f32 %v1308_v37, 0.0  ;;  %v1408_v50 = vpack.c.bf16 %v1386_v39, %v1385_v47  ;;  %v1329_v54 = vadd.f32 %v2526_v43, %v3022_v36 }
 0x380   : > { %v1320_v48 = vpop.f32.mrf.mxu1 }
 0x381   : > { %v1407_v49 = vpack.c.bf16 %v1384_v46, %v1383_v45  ;;  %v1321_v52 = vadd.f32 %v1320_v48, %v3022_v36  ;;  %v1389_v60 = vmax.f32 %v1329_v54, 0.0 }
 0x382   : > { %v2527_v51 = vpop.f32.mrf.mxu1 }
 0x383   : > { %v1332_v53 = vadd.f32 %v2527_v51, %v3022_v36  ;;  %2568 = vmatprep.mubr.bf16.mxu0 %v1407_v49  ;;  %v1387_v58 = vmax.f32 %v1321_v52, 0.0 }
 0x384   : > { %v1323_v55 = vpop.f32.mrf.mxu1  ;;  %2569 = vmatmul.mubr.bf16.gmra.mxu0 %v1408_v50 }
 0x385   : > { %v1324_v42 = vadd.f32 %v1323_v55, %v3022_v36  ;;  %v1390_v56 = vmax.f32 %v1332_v53, 0.0 }
 0x386   : > { %v2530_v57 = vpop.f32.mrf.mxu1 }
 0x387   : > { %v1388_v59 = vmax.f32 %v1324_v42, 0.0  ;;  %v1410_v63 = vpack.c.bf16 %v1390_v56, %v1389_v60  ;;  %v1345_v3 = vadd.f32 %v2530_v57, %v3022_v36 }
 0x388   : > { %v1336_v61 = vpop.f32.mrf.mxu1 }
 0x389   : > { %v1409_v62 = vpack.c.bf16 %v1388_v59, %v1387_v58  ;;  %v1337_v1 = vadd.f32 %v1336_v61, %v3022_v36  ;;  %v1393_v10 = vmax.f32 %v1345_v3, 0.0 }
 0x38a   : > { %v2531_v0 = vpop.f32.mrf.mxu1 }
 0x38b   : > { %v1348_v2 = vadd.f32 %v2531_v0, %v3022_v36  ;;  %2572 = vmatprep.mubr.bf16.mxu0 %v1409_v62  ;;  %v1391_v8 = vmax.f32 %v1337_v1, 0.0 }
 0x38c   : > { %v1339_v4 = vpop.f32.mrf.mxu1  ;;  %2573 = vmatmul.mubr.bf16.gmra.mxu0 %v1410_v63 }
 0x38d   : > { %v1340_v5 = vadd.f32 %v1339_v4, %v3022_v36  ;;  %v1394_v6 = vmax.f32 %v1348_v2, 0.0 }
 0x38e   : > { %v2534_v7 = vpop.f32.mrf.mxu1 }
 0x38f   : > { %v1392_v9 = vmax.f32 %v1340_v5, 0.0  ;;  %v1412_v13 = vpack.c.bf16 %v1394_v6, %v1393_v10  ;;  %v1361_v14 = vadd.f32 %v2534_v7, %v3022_v36 }
 0x390   : > { %v1352_v11 = vpop.f32.mrf.mxu1 }
 0x391   : > { %v1411_v12 = vpack.c.bf16 %v1392_v9, %v1391_v8  ;;  %v1353_v16 = vadd.f32 %v1352_v11, %v3022_v36  ;;  %v1397_v20 = vmax.f32 %v1361_v14, 0.0 }
 0x392   : > { %v2535_v15 = vpop.f32.mrf.mxu1 }
 0x393   : > { %v1364_v17 = vadd.f32 %v2535_v15, %v3022_v36  ;;  %2576 = vmatprep.mubr.bf16.mxu0 %v1411_v12  ;;  %v1395_v22 = vmax.f32 %v1353_v16, 0.0 }
 0x394   : > { %v1355_v18 = vpop.f32.mrf.mxu1  ;;  %2577 = vmatmul.mubr.bf16.gmra.mxu0 %v1412_v13 }
 0x395   : > { %v1356_v19 = vadd.f32 %v1355_v18, %v3022_v36  ;;  %v1398_v21 = vmax.f32 %v1364_v17, 0.0  ;;  %v3063_v36 = vld [vmem:[%s3146_s2] sm:$0xff] }
 0x396   : > { %v3066_v29 = vrot.slane %v3063_v36, %v1434_v27 }
 0x397   : > { %v1396_v23 = vmax.f32 %v1356_v19, 0.0  ;;  %v1414_v25 = vpack.c.bf16 %v1398_v21, %v1397_v20 }
 0x399   : > { %v1413_v24 = vpack.c.bf16 %v1396_v23, %v1395_v22 }
 0x39b   : > { %2580 = vmatprep.mubr.bf16.mxu0 %v1413_v24 }
 0x39c   : > { %2581 = vmatmul.mubr.bf16.gmra.mxu0 %v1414_v25 }
 0x424   : > { %v2554_v28 = vpop.f32.mrf.mxu0 }
 0x425   : > { %v1527_v41 = vadd.f32 %v2554_v28, %v3066_v29 }
 0x426   : > { %v1518_v30 = vpop.f32.mrf.mxu0 }
 0x427   : > { %v1519_v38 = vadd.f32 %v1518_v30, %v3066_v29  ;;  %v1647_v43 = vmax.f32 %v1527_v41, 0.0 }
 0x428   : > { %v2555_v31 = vpop.f32.mrf.mxu0 }
 0x429   : > { %v1530_v32 = vadd.f32 %v2555_v31, %v3066_v29  ;;  %v1645_v37 = vmax.f32 %v1519_v38, 0.0 }
 0x42a   : > { %v1521_v33 = vpop.f32.mrf.mxu0 }
 0x42b   : > { %v1522_v44 = vadd.f32 %v1521_v33, %v3066_v29  ;;  %v1648_v34 = vmax.f32 %v1530_v32, 0.0 }
 0x42c   : > { %v2558_v35 = vpop.f32.mrf.mxu0 }
 0x42d   : > { %v1646_v39 = vmax.f32 %v1522_v44, 0.0  ;;  %v1678_v47 = vpack.c.bf16 %v1648_v34, %v1647_v43  ;;  %v1543_v51 = vadd.f32 %v2558_v35, %v3066_v29 }
 0x42e   : > { %v1534_v45 = vpop.f32.mrf.mxu0 }
 0x42f   : > { %v1677_v46 = vpack.c.bf16 %v1646_v39, %v1645_v37  ;;  %v1535_v49 = vadd.f32 %v1534_v45, %v3066_v29  ;;  %v1651_v57 = vmax.f32 %v1543_v51, 0.0 }
 0x430   : > { %v2559_v48 = vpop.f32.mrf.mxu0 }
 0x431   : > { %v1546_v50 = vadd.f32 %v2559_v48, %v3066_v29  ;;  %2600 = vmatprep.mubr.bf16.mxu1 %v1677_v46  ;;  %v1649_v42 = vmax.f32 %v1535_v49, 0.0 }
 0x432   : > { %v1537_v52 = vpop.f32.mrf.mxu0  ;;  %2601 = vmatmul.mubr.bf16.vlgmr.msra.gmra.mxu1 %v1678_v47 }
 0x433   : > { %v1538_v53 = vadd.f32 %v1537_v52, %v3066_v29  ;;  %v1652_v54 = vmax.f32 %v1546_v50, 0.0 }
 0x434   : > { %v2562_v55 = vpop.f32.mrf.mxu0 }
 0x435   : > { %v1650_v56 = vmax.f32 %v1538_v53, 0.0  ;;  %v1680_v60 = vpack.c.bf16 %v1652_v54, %v1651_v57  ;;  %v1559_v0 = vadd.f32 %v2562_v55, %v3066_v29 }
 0x436   : > { %v1550_v58 = vpop.f32.mrf.mxu0 }
 0x437   : > { %v1679_v59 = vpack.c.bf16 %v1650_v56, %v1649_v42  ;;  %v1551_v62 = vadd.f32 %v1550_v58, %v3066_v29  ;;  %v1655_v7 = vmax.f32 %v1559_v0, 0.0 }
 0x438   : > { %v2563_v61 = vpop.f32.mrf.mxu0 }
 0x439   : > { %v1562_v63 = vadd.f32 %v2563_v61, %v3066_v29  ;;  %2604 = vmatprep.mubr.bf16.mxu1 %v1679_v59  ;;  %v1653_v5 = vmax.f32 %v1551_v62, 0.0 }
 0x43a   : > { %v1553_v1 = vpop.f32.mrf.mxu0  ;;  %2605 = vmatmul.mubr.bf16.gmra.mxu1 %v1680_v60 }
 0x43b   : > { %v1554_v2 = vadd.f32 %v1553_v1, %v3066_v29  ;;  %v1656_v3 = vmax.f32 %v1562_v63, 0.0 }
 0x43c   : > { %v2566_v4 = vpop.f32.mrf.mxu0 }
 0x43d   : > { %v1654_v6 = vmax.f32 %v1554_v2, 0.0  ;;  %v1682_v10 = vpack.c.bf16 %v1656_v3, %v1655_v7  ;;  %v1575_v14 = vadd.f32 %v2566_v4, %v3066_v29 }
 0x43e   : > { %v1566_v8 = vpop.f32.mrf.mxu0 }
 0x43f   : > { %v1681_v9 = vpack.c.bf16 %v1654_v6, %v1653_v5  ;;  %v1567_v12 = vadd.f32 %v1566_v8, %v3066_v29  ;;  %v1659_v21 = vmax.f32 %v1575_v14, 0.0 }
 0x440   : > { %v2567_v11 = vpop.f32.mrf.mxu0 }
 0x441   : > { %v1578_v13 = vadd.f32 %v2567_v11, %v3066_v29  ;;  %2608 = vmatprep.mubr.bf16.mxu1 %v1681_v9  ;;  %v1657_v19 = vmax.f32 %v1567_v12, 0.0 }
 0x442   : > { %v1569_v15 = vpop.f32.mrf.mxu0  ;;  %2609 = vmatmul.mubr.bf16.gmra.mxu1 %v1682_v10 }
 0x443   : > { %v1570_v16 = vadd.f32 %v1569_v15, %v3066_v29  ;;  %v1660_v17 = vmax.f32 %v1578_v13, 0.0 }
 0x444   : > { %v2570_v18 = vpop.f32.mrf.mxu0 }
 0x445   : > { %v1658_v20 = vmax.f32 %v1570_v16, 0.0  ;;  %v1684_v24 = vpack.c.bf16 %v1660_v17, %v1659_v21  ;;  %v1591_v28 = vadd.f32 %v2570_v18, %v3066_v29  ;;  %v1712_v18 = vsub.s32 5, %v2833_v40 }
 0x446   : > { %v1582_v22 = vpop.f32.mrf.mxu0 }
 0x447   : > { %v1683_v23 = vpack.c.bf16 %v1658_v20, %v1657_v19  ;;  %v1583_v26 = vadd.f32 %v1582_v22, %v3066_v29  ;;  %v1663_v44 = vmax.f32 %v1591_v28, 0.0  ;;  %v3102_v20 = vrot.slane %v3063_v36, %v1712_v18 }
 0x448   : > { %v2571_v25 = vpop.f32.mrf.mxu0 }
 0x449   : > { %v1594_v27 = vadd.f32 %v2571_v25, %v3066_v29  ;;  %2612 = vmatprep.mubr.bf16.mxu1 %v1683_v23  ;;  %v1661_v41 = vmax.f32 %v1583_v26, 0.0 }
 0x44a   : > { %v1585_v30 = vpop.f32.mrf.mxu0  ;;  %2613 = vmatmul.mubr.bf16.gmra.mxu1 %v1684_v24 }
 0x44b   : > { %v1586_v31 = vadd.f32 %v1585_v30, %v3066_v29  ;;  %v1664_v38 = vmax.f32 %v1594_v27, 0.0 }
 0x44c   : > { %v2574_v32 = vpop.f32.mrf.mxu0 }
 0x44d   : > { %v1662_v33 = vmax.f32 %v1586_v31, 0.0  ;;  %v1686_v37 = vpack.c.bf16 %v1664_v38, %v1663_v44  ;;  %v1607_v46 = vadd.f32 %v2574_v32, %v3066_v29 }
 0x44e   : > { %v1598_v34 = vpop.f32.mrf.mxu0 }
 0x44f   : > { %v1685_v35 = vpack.c.bf16 %v1662_v33, %v1661_v41  ;;  %v1599_v43 = vadd.f32 %v1598_v34, %v3066_v29  ;;  %v1667_v53 = vmax.f32 %v1607_v46, 0.0 }
 0x450   : > { %v2575_v39 = vpop.f32.mrf.mxu0 }
 0x451   : > { %v1610_v45 = vadd.f32 %v2575_v39, %v3066_v29  ;;  %2616 = vmatprep.mubr.bf16.mxu1 %v1685_v35  ;;  %v1665_v51 = vmax.f32 %v1599_v43, 0.0 }
 0x452   : > { %v1601_v47 = vpop.f32.mrf.mxu0  ;;  %2617 = vmatmul.mubr.bf16.gmra.mxu1 %v1686_v37 }
 0x453   : > { %v1602_v48 = vadd.f32 %v1601_v47, %v3066_v29  ;;  %v1668_v49 = vmax.f32 %v1610_v45, 0.0 }
 0x454   : > { %v2578_v50 = vpop.f32.mrf.mxu0 }
 0x455   : > { %v1666_v52 = vmax.f32 %v1602_v48, 0.0  ;;  %v1688_v42 = vpack.c.bf16 %v1668_v49, %v1667_v53  ;;  %v1623_v59 = vadd.f32 %v2578_v50, %v3066_v29 }
 0x456   : > { %v1614_v54 = vpop.f32.mrf.mxu0 }
 0x457   : > { %v1687_v55 = vpack.c.bf16 %v1666_v52, %v1665_v51  ;;  %v1615_v57 = vadd.f32 %v1614_v54, %v3066_v29  ;;  %v1671_v2 = vmax.f32 %v1623_v59, 0.0 }
 0x458   : > { %v2579_v56 = vpop.f32.mrf.mxu0 }
 0x459   : > { %v1626_v58 = vadd.f32 %v2579_v56, %v3066_v29  ;;  %2620 = vmatprep.mubr.bf16.mxu1 %v1687_v55  ;;  %v1669_v0 = vmax.f32 %v1615_v57, 0.0 }
 0x45a   : > { %v1617_v60 = vpop.f32.mrf.mxu0  ;;  %2621 = vmatmul.mubr.bf16.gmra.mxu1 %v1688_v42 }
 0x45b   : > { %v1618_v61 = vadd.f32 %v1617_v60, %v3066_v29  ;;  %v1672_v62 = vmax.f32 %v1626_v58, 0.0 }
 0x45c   : > { %v2582_v63 = vpop.f32.mrf.mxu0 }
 0x45d   : > { %v1670_v1 = vmax.f32 %v1618_v61, 0.0  ;;  %v1690_v5 = vpack.c.bf16 %v1672_v62, %v1671_v2  ;;  %v1639_v9 = vadd.f32 %v2582_v63, %v3066_v29 }
 0x45e   : > { %v1630_v3 = vpop.f32.mrf.mxu0 }
 0x45f   : > { %v1689_v4 = vpack.c.bf16 %v1670_v1, %v1669_v0  ;;  %v1631_v7 = vadd.f32 %v1630_v3, %v3066_v29  ;;  %v1675_v15 = vmax.f32 %v1639_v9, 0.0 }
 0x460   : > { %v2583_v6 = vpop.f32.mrf.mxu0 }
 0x461   : > { %v1642_v8 = vadd.f32 %v2583_v6, %v3066_v29  ;;  %2624 = vmatprep.mubr.bf16.mxu1 %v1689_v4  ;;  %v1673_v13 = vmax.f32 %v1631_v7, 0.0 }
 0x462   : > { %v1633_v10 = vpop.f32.mrf.mxu0  ;;  %2625 = vmatmul.mubr.bf16.gmra.mxu1 %v1690_v5 }
 0x463   : > { %v1634_v11 = vadd.f32 %v1633_v10, %v3066_v29  ;;  %v1676_v12 = vmax.f32 %v1642_v8, 0.0 }
 0x465   : > { %v1674_v14 = vmax.f32 %v1634_v11, 0.0  ;;  %v1692_v17 = vpack.c.bf16 %v1676_v12, %v1675_v15 }
 0x467   : > { %v1691_v16 = vpack.c.bf16 %v1674_v14, %v1673_v13 }
 0x469   : > { %2628 = vmatprep.mubr.bf16.mxu1 %v1691_v16 }
 0x46a   : > { %2629 = vmatmul.mubr.bf16.gmra.mxu1 %v1692_v17 }
 0x4f2   : > { %v2602_v19 = vpop.f32.mrf.mxu1 }
 0x4f3   : > { %v1805_v27 = vadd.f32 %v2602_v19, %v3102_v20 }
 0x4f4   : > { %v1796_v21 = vpop.f32.mrf.mxu1 }
 0x4f5   : > { %v1797_v22 = vadd.f32 %v1796_v21, %v3102_v20 }
 0x4f6   : > { %v2603_v23 = vpop.f32.mrf.mxu1 }
 0x4f7   : > { %1923 = vxpose.xlu0.b32.start [1/16] (narrow) %v1797_v22, 8  ;;  %v1808_v30 = vadd.f32 %v2603_v23, %v3102_v20 }
 0x4f8   : > { %v1799_v29 = vpop.f32.mrf.mxu1 }
 0x4f9   : > { %v1800_v24 = vadd.f32 %v1799_v29, %v3102_v20 }
 0x4fa   : > { %v2606_v25 = vpop.f32.mrf.mxu1 }
 0x4fb   : > { %1924 = vxpose.xlu0.b32.cont [2/16] (narrow) %v1800_v24, 8  ;;  %v1821_v35 = vadd.f32 %v2606_v25, %v3102_v20 }
 0x4fc   : > { %v1812_v26 = vpop.f32.mrf.mxu1 }
 0x4fd   : > { %v1813_v38 = vadd.f32 %v1812_v26, %v3102_v20 }
 0x4fe   : > { %v2607_v28 = vpop.f32.mrf.mxu1 }
 0x4ff   : > { %1925 = vxpose.xlu0.b32.cont [3/16] (narrow) %v1805_v27, 8  ;;  %v1824_v43 = vadd.f32 %v2607_v28, %v3102_v20 }
 0x500   : > { %v1815_v40 = vpop.f32.mrf.mxu1 }
 0x501   : > { %v1816_v33 = vadd.f32 %v1815_v40, %v3102_v20 }
 0x502   : > { %v2610_v36 = vpop.f32.mrf.mxu1 }
 0x503   : > { %1926 = vxpose.xlu0.b32.cont [4/16] (narrow) %v1808_v30, 8  ;;  %v1837_v54 = vadd.f32 %v2610_v36, %v3102_v20 }
 0x504   : > { %v1828_v31 = vpop.f32.mrf.mxu1 }
 0x505   : > { %v1829_v47 = vadd.f32 %v1828_v31, %v3102_v20 }
 0x506   : > { %v2611_v32 = vpop.f32.mrf.mxu1 }
 0x507   : > { %1927 = vxpose.xlu0.b32.cont [5/16] (narrow) %v1813_v38, 8  ;;  %v1840_v56 = vadd.f32 %v2611_v32, %v3102_v20 }
 0x508   : > { %v1831_v41 = vpop.f32.mrf.mxu1 }
 0x509   : > { %v1832_v51 = vadd.f32 %v1831_v41, %v3102_v20 }
 0x50a   : > { %v2614_v44 = vpop.f32.mrf.mxu1 }
 0x50b   : > { %1928 = vxpose.xlu0.b32.cont [6/16] (narrow) %v1816_v33, 8  ;;  %v1853_v1 = vadd.f32 %v2614_v44, %v3102_v20 }
 0x50c   : > { %v1844_v34 = vpop.f32.mrf.mxu1 }
 0x50d   : > { %v1845_v59 = vadd.f32 %v1844_v34, %v3102_v20 }
 0x50e   : > { %v2615_v37 = vpop.f32.mrf.mxu1 }
 0x50f   : > { %1929 = vxpose.xlu0.b32.cont [7/16] (narrow) %v1821_v35, 8  ;;  %v1856_v4 = vadd.f32 %v2615_v37, %v3102_v20 }
 0x510   : > { %v1847_v39 = vpop.f32.mrf.mxu1 }
 0x511   : > { %v1848_v62 = vadd.f32 %v1847_v39, %v3102_v20 }
 0x512   : > { %v2618_v45 = vpop.f32.mrf.mxu1 }
 0x513   : > { %1930 = vxpose.xlu0.b32.cont [8/16] (narrow) %v1824_v43, 8  ;;  %v1869_v55 = vadd.f32 %v2618_v45, %v3102_v20 }
 0x514   : > { %v1860_v46 = vpop.f32.mrf.mxu1 }
 0x515   : > { %v1861_v48 = vadd.f32 %v1860_v46, %v3102_v20 }
 0x516   : > { %v2619_v49 = vpop.f32.mrf.mxu1 }
 0x517   : > { %1955 = vxpose.xlu1.b32.start [1/16] (narrow) %v1861_v48, 8  ;;  %1931 = vxpose.xlu0.b32.cont [9/16] (narrow) %v1829_v47, 8  ;;  %v1872_v57 = vadd.f32 %v2619_v49, %v3102_v20 }
 0x518   : > { %v1863_v50 = vpop.f32.mrf.mxu1 }
 0x519   : > { %v1864_v52 = vadd.f32 %v1863_v50, %v3102_v20 }
 0x51a   : > { %v2622_v53 = vpop.f32.mrf.mxu1 }
 0x51b   : > { %1956 = vxpose.xlu1.b32.cont [2/16] (narrow) %v1864_v52, 8  ;;  %1932 = vxpose.xlu0.b32.cont [10/16] (narrow) %v1832_v51, 8  ;;  %v1885_v2 = vadd.f32 %v2622_v53, %v3102_v20 }
 0x51c   : > { %v1876_v42 = vpop.f32.mrf.mxu1 }
 0x51d   : > { %v1877_v60 = vadd.f32 %v1876_v42, %v3102_v20 }
 0x51e   : > { %v2623_v58 = vpop.f32.mrf.mxu1 }
 0x51f   : > { %1957 = vxpose.xlu1.b32.cont [3/16] (narrow) %v1869_v55, 8  ;;  %1933 = vxpose.xlu0.b32.cont [11/16] (narrow) %v1837_v54, 8  ;;  %v1888_v5 = vadd.f32 %v2623_v58, %v3102_v20 }
 0x520   : > { %v1879_v61 = vpop.f32.mrf.mxu1 }
 0x521   : > { %v1880_v63 = vadd.f32 %v1879_v61, %v3102_v20 }
 0x522   : > { %v2626_v0 = vpop.f32.mrf.mxu1 }
 0x523   : > { %1958 = vxpose.xlu1.b32.cont [4/16] (narrow) %v1872_v57, 8  ;;  %1934 = vxpose.xlu0.b32.cont [12/16] (narrow) %v1840_v56, 8  ;;  %v1901_v11 = vadd.f32 %v2626_v0, %v3102_v20 }
 0x524   : > { %v1892_v3 = vpop.f32.mrf.mxu1 }
 0x525   : > { %v1893_v7 = vadd.f32 %v1892_v3, %v3102_v20 }
 0x526   : > { %v2627_v6 = vpop.f32.mrf.mxu1 }
 0x527   : > { %1959 = vxpose.xlu1.b32.cont [5/16] (narrow) %v1877_v60, 8  ;;  %1935 = vxpose.xlu0.b32.cont [13/16] (narrow) %v1845_v59, 8  ;;  %v1904_v13 = vadd.f32 %v2627_v6, %v3102_v20 }
 0x528   : > { %v1895_v8 = vpop.f32.mrf.mxu1 }
 0x529   : > { %v1896_v9 = vadd.f32 %v1895_v8, %v3102_v20 }
 0x52a   : > { %v2630_v10 = vpop.f32.mrf.mxu1 }
 0x52b   : > { %1960 = vxpose.xlu1.b32.cont [6/16] (narrow) %v1880_v63, 8  ;;  %1936 = vxpose.xlu0.b32.cont [14/16] (narrow) %v1848_v62, 8  ;;  %v1917_v18 = vadd.f32 %v2630_v10, %v3102_v20 }
 0x52c   : > { %v1908_v12 = vpop.f32.mrf.mxu1 }
 0x52d   : > { %v1909_v15 = vadd.f32 %v1908_v12, %v3102_v20 }
 0x52e   : > { %v2631_v14 = vpop.f32.mrf.mxu1 }
 0x52f   : > { %1961 = vxpose.xlu1.b32.cont [7/16] (narrow) %v1885_v2, 8  ;;  %1937 = vxpose.xlu0.b32.cont [15/16] (narrow) %v1853_v1, 8  ;;  %v1920_v19 = vadd.f32 %v2631_v14, %v3102_v20 }
 0x530   : > { %v1911_v16 = vpop.f32.mrf.mxu1 }
 0x531   : > { %v1912_v17 = vadd.f32 %v1911_v16, %v3102_v20 }
 0x533   : > { %1962 = vxpose.xlu1.b32.cont [8/16] (narrow) %v1888_v5, 8  ;;  %1938 = vxpose.xlu0.b32.end [16/16] (narrow) %v1856_v4, 8 }
 0x537   : > { %1963 = vxpose.xlu1.b32.cont [9/16] (narrow) %v1893_v7, 8 }
 0x53b   : > { %1964 = vxpose.xlu1.b32.cont [10/16] (narrow) %v1896_v9, 8 }
 0x53f   : > { %1965 = vxpose.xlu1.b32.cont [11/16] (narrow) %v1901_v11, 8 }
 0x543   : > { %1966 = vxpose.xlu1.b32.cont [12/16] (narrow) %v1904_v13, 8 }
 0x547   : > { %1967 = vxpose.xlu1.b32.cont [13/16] (narrow) %v1909_v15, 8 }
 0x54b   : > { %1968 = vxpose.xlu1.b32.cont [14/16] (narrow) %v1912_v17, 8 }
 0x54f   : > { %1969 = vxpose.xlu1.b32.cont [15/16] (narrow) %v1917_v18, 8 }
 0x553   : > { %1970 = vxpose.xlu1.b32.end [16/16] (narrow) %v1920_v19, 8 }
 0x573   : > { %v1939_v21 = vpop.trf.xlu0 }
 0x574   : > { %1987 = vst [vmem:[%s172_s23] sm:$0xff] %v1939_v21 }
 0x593   : > { %v1971_v22 = vpop.trf.xlu1 }
 0x594   : > { %1988 = vst [vmem:[%s172_s23 + $0x8] sm:$0xff] %v1971_v22 }
 0x595 PF: > { %s13_s12 = sadd.s32 1, %s2711_s12  }
 0x596   : > { %p10_p5 = scmp.ge.s32.totalorder %s13_s12, 4  }
 0x598   :  { %12 = sbr.rel (!%p10_p5) target bundleno = 1 (0x1), region = 67 }

</bundles_post_ra>
